<compile_context>
chip_gen: v7x
topology: tpu7x:2x2x1
jax: 0.10.0
libtpu: 0.0.40
codegen_flags: <defaults>
</compile_context>

<pallas_src>
import functools

import jax
import jax.numpy as jnp
from jax import lax
from jax.experimental import pallas as pl
from jax.experimental.pallas import tpu as pltpu

BN_EPS = 1e-5


def basic_block_kernel(x_ref, w1_ref, s1_ref, b1_ref, w2_ref, s2_ref, b2_ref,
                       out_ref, mid_ref, *, bottom_zero_row):
    """One (image, row-tile) step of the fused BasicBlock.

    x_ref  : (TH+4, W+2, Cin)   halo'd, zero-padded NHWC input tile
    w1_ref : (9*Cin, Cmid)      conv1 weight, im2col-flattened (ky, kx, cin)
    w2_ref : (9*Cmid, Cout)     conv2 weight, im2col-flattened
    s*/b*  : (1, C)             folded BatchNorm scale / bias
    out_ref: (TH, W, Cout)      output tile
    mid_ref: (TH+2, W+2, Cmid)  VMEM scratch: conv1->BN->ReLU, padded in W only
    """
    THp4, Wp2, Cin = x_ref.shape
    TH, W = THp4 - 4, Wp2 - 2
    THc = TH + 2                      # conv1 rows computed (conv2 needs +-1 row)
    Cmid = w1_ref.shape[1]
    Cout = w2_ref.shape[1]

    t = pl.program_id(1)
    n_t = pl.num_programs(1)
    taps = [(dy, dx) for dy in range(3) for dx in range(3)]

    # ---- conv1 as a single matmul with K = 9*Cin (im2col via concat) ----
    col1 = jnp.concatenate(
        [x_ref[dy:dy + THc, dx:dx + W, :].reshape(THc * W, Cin)
         for dy, dx in taps], axis=1)                        # (THc*W, 9*Cin)
    mid = jnp.dot(col1, w1_ref[...], preferred_element_type=jnp.float32)
    mid = jnp.maximum(mid * s1_ref[...] + b1_ref[...], 0.0)  # BN1 + ReLU

    # ---- stage conv1 output in VMEM; zero only the 1-px W borders ----
    mid_ref[:, 1:W + 1, :] = mid.reshape(THc, W, Cmid)
    zero_col = jnp.zeros((THc, 1, Cmid), jnp.float32)
    mid_ref[:, 0:1, :] = zero_col
    mid_ref[:, W + 1:W + 2, :] = zero_col

    # conv1 rows that sit in the image's zero padding (image rows -1 and H)
    # must be exactly zero before conv2 (conv of the zero-pad region != 0).
    zero_row = jnp.zeros((1, Wp2, Cmid), jnp.float32)

    @pl.when(t == 0)
    def _():
        mid_ref[0:1, :, :] = zero_row

    @pl.when(t == n_t - 1)
    def _():
        mid_ref[bottom_zero_row:bottom_zero_row + 1, :, :] = zero_row

    # ---- conv2 as a single matmul with K = 9*Cmid ----
    col2 = jnp.concatenate(
        [mid_ref[dy:dy + TH, dx:dx + W, :].reshape(TH * W, Cmid)
         for dy, dx in taps], axis=1)                        # (TH*W, 9*Cmid)
    out = jnp.dot(col2, w2_ref[...], preferred_element_type=jnp.float32)
    out = out * s2_ref[...] + b2_ref[...]                    # BN2

    # identity residual: interior of the same input tile (no duplicate input)
    residual = x_ref[2:TH + 2, 1:W + 1, :].reshape(TH * W, Cin)
    out_ref[...] = jnp.maximum(out + residual, 0.0).reshape(TH, W, Cout)


def fold_bn(gamma, beta, running_mean, running_var, eps=BN_EPS):
    scale = gamma / jnp.sqrt(running_var + eps)
    bias = beta - running_mean * scale
    return scale, bias


@functools.partial(jax.jit, static_argnames=("row_tile",))
def basic_block_forward(x_nchw, params, row_tile=8):
    """x_nchw: (N, Cin, H, W) float32. Returns (N, Cout, H, W)."""
    w1, g1, be1, m1, v1, w2, g2, be2, m2, v2 = params
    N, Cin, H, W = x_nchw.shape
    Cmid, Cout = w1.shape[0], w2.shape[0]
    assert w1.shape == (Cmid, Cin, 3, 3) and w2.shape == (Cout, Cmid, 3, 3)
    assert Cin == Cout, "identity residual requires inplanes == planes (downsample=None)"

    # NCHW -> NHWC activations, OIHW -> (9*Cin, Cout) im2col-flattened weights.
    x = jnp.transpose(x_nchw, (0, 2, 3, 1)).astype(jnp.float32)
    w1_flat = jnp.transpose(w1, (2, 3, 1, 0)).reshape(9 * Cin, Cmid).astype(jnp.float32)
    w2_flat = jnp.transpose(w2, (2, 3, 1, 0)).reshape(9 * Cmid, Cout).astype(jnp.float32)
    s1, b1 = fold_bn(g1, be1, m1, v1)
    s2, b2 = fold_bn(g2, be2, m2, v2)

    # Row tiling: each tile produces TH output rows and consumes TH+4 halo'd
    # input rows (two fused 3x3 convs -> a 2-row halo on each side).
    TH = min(row_tile, H)
    n_t = (H + TH - 1) // TH
    d = n_t * TH - H                       # bottom overhang rows (discarded)
    Hr = n_t * TH

    # Zero-pad (2 rows / 1 col per side, + overhang) and materialize the
    # overlapping halo'd row tiles so plain Blocked BlockSpecs can pipeline
    # them (single fused XLA pad+gather in HBM).
    xp = jnp.pad(x, ((0, 0), (2, 2 + d), (1, 1), (0, 0)))
    x_tiles = jnp.stack([xp[:, t * TH:t * TH + TH + 4] for t in range(n_t)],
                        axis=1)            # (N, n_t, TH+4, W+2, Cin)

    kernel = functools.partial(basic_block_kernel, bottom_zero_row=TH + 1 - d)

    grid_spec = pltpu.PrefetchScalarGridSpec(
        num_scalar_prefetch=0,
        grid=(N, n_t),
        in_specs=[
            pl.BlockSpec((None, None, TH + 4, W + 2, Cin),
                         lambda n, t: (n, t, 0, 0, 0)),
            pl.BlockSpec((9 * Cin, Cmid), lambda n, t: (0, 0)),
            pl.BlockSpec((1, Cmid), lambda n, t: (0, 0)),
            pl.BlockSpec((1, Cmid), lambda n, t: (0, 0)),
            pl.BlockSpec((9 * Cmid, Cout), lambda n, t: (0, 0)),
            pl.BlockSpec((1, Cout), lambda n, t: (0, 0)),
            pl.BlockSpec((1, Cout), lambda n, t: (0, 0)),
        ],
        out_specs=pl.BlockSpec((None, TH, W, Cout), lambda n, t: (n, t, 0, 0)),
        scratch_shapes=[pltpu.VMEM((TH + 2, W + 2, Cmid), jnp.float32)],
    )

    out_nhwc = pl.pallas_call(
        kernel,
        out_shape=jax.ShapeDtypeStruct((N, Hr, W, Cout), jnp.float32),
        grid_spec=grid_spec,
        compiler_params=pltpu.CompilerParams(
            dimension_semantics=("parallel", "parallel"),
            vmem_limit_bytes=48 * 1024 * 1024),
    )(x_tiles, w1_flat, s1.reshape(1, Cmid), b1.reshape(1, Cmid),
      w2_flat, s2.reshape(1, Cout), b2.reshape(1, Cout))

    return jnp.transpose(out_nhwc[:, :H], (0, 3, 1, 2))   # NHWC -> NCHW


def reference_forward(x_nchw, params):
    """Pure-JAX reference (lax.conv) with identical semantics, for checking."""
    w1, g1, be1, m1, v1, w2, g2, be2, m2, v2 = params
    x = jnp.transpose(x_nchw, (0, 2, 3, 1))
    w1_hwio = jnp.transpose(w1, (2, 3, 1, 0))
    w2_hwio = jnp.transpose(w2, (2, 3, 1, 0))
    dn = lax.conv_dimension_numbers(x.shape, w1_hwio.shape,
                                    ('NHWC', 'HWIO', 'NHWC'))
    s1, b1 = fold_bn(g1, be1, m1, v1)
    s2, b2 = fold_bn(g2, be2, m2, v2)
    out = lax.conv_general_dilated(x, w1_hwio, (1, 1), 'SAME',
                                   dimension_numbers=dn)
    out = jnp.maximum(out * s1 + b1, 0.0)
    out = lax.conv_general_dilated(out, w2_hwio, (1, 1), 'SAME',
                                   dimension_numbers=dn)
    out = out * s2 + b2 + x
    out = jnp.maximum(out, 0.0)
    return jnp.transpose(out, (0, 3, 1, 2))


def make_params(key, inplanes, planes):
    ks = jax.random.split(key, 8)
    w1 = 0.1 * jax.random.normal(ks[0], (planes, inplanes, 3, 3), jnp.float32)
    w2 = 0.1 * jax.random.normal(ks[1], (planes, planes, 3, 3), jnp.float32)
    g1 = 1.0 + 0.1 * jax.random.normal(ks[2], (planes,), jnp.float32)
    be1 = 0.1 * jax.random.normal(ks[3], (planes,), jnp.float32)
    m1 = 0.1 * jax.random.normal(ks[4], (planes,), jnp.float32)
    v1 = 1.0 + 0.1 * jnp.abs(jax.random.normal(ks[5], (planes,), jnp.float32))
    g2 = 1.0 + 0.1 * jax.random.normal(ks[6], (planes,), jnp.float32)
    be2 = 0.1 * jax.random.normal(ks[7], (planes,), jnp.float32)
    m2 = jnp.zeros((planes,), jnp.float32)
    v2 = jnp.ones((planes,), jnp.float32)
    return (w1, g1, be1, m1, v1, w2, g2, be2, m2, v2)


if __name__ == "__main__":
    key = jax.random.PRNGKey(0)
    kx, kp = jax.random.split(key)

    N, C, H, W = 2, 4, 16, 16           # inplanes = planes = 4, stride = 1
    x = jax.random.normal(kx, (N, C, H, W), jnp.float32)
    params = make_params(kp, inplanes=C, planes=C)

    # row_tile=8 -> grid = (N=2, n_t=2): exercises the multi-tile halo path.
    out = basic_block_forward(x, params, row_tile=8)
    out = jax.block_until_ready(out)

    ref = reference_forward(x, params)
    assert out.shape == (N, C, H, W), out.shape
    max_err = float(jnp.max(jnp.abs(out - ref)))
    assert jnp.allclose(out, ref, atol=1e-3, rtol=1e-3), max_err

    print("KERNEL_OK")
</pallas_src>

<mosaic_0001>
module attributes {stable_mosaic.version = 11 : i64} {
  func.func @basic_block_kernel(%arg0: i32, %arg1: i32, %arg2: memref<1x1x12x18x4xf32, #tpu.memory_space<vmem>>, %arg3: memref<36x4xf32, #tpu.memory_space<vmem>>, %arg4: memref<1x4xf32, #tpu.memory_space<vmem>>, %arg5: memref<1x4xf32, #tpu.memory_space<vmem>>, %arg6: memref<36x4xf32, #tpu.memory_space<vmem>>, %arg7: memref<1x4xf32, #tpu.memory_space<vmem>>, %arg8: memref<1x4xf32, #tpu.memory_space<vmem>>, %arg9: memref<1x8x16x4xf32, #tpu.memory_space<vmem>>, %arg10: memref<10x18x4xf32, #tpu.memory_space<vmem>>) attributes {dimension_semantics = [#tpu.dimension_semantics<parallel>, #tpu.dimension_semantics<parallel>], iteration_bounds = array<i64: 2, 2>, scalar_prefetch = 0 : i64, scratch_operands = 1 : i64, tpu.core_type = #tpu.core_type<tc>, window_params = [{transform_indices = @transform_0, window_bounds = array<i64: 1, 1, 12, 18, 4>}, {pipeline_mode = #tpu.pipeline_mode<synchronous>, transform_indices = @transform_1, window_bounds = array<i64: 36, 4>}, {pipeline_mode = #tpu.pipeline_mode<synchronous>, transform_indices = @transform_2, window_bounds = array<i64: 1, 4>}, {pipeline_mode = #tpu.pipeline_mode<synchronous>, transform_indices = @transform_3, window_bounds = array<i64: 1, 4>}, {pipeline_mode = #tpu.pipeline_mode<synchronous>, transform_indices = @transform_4, window_bounds = array<i64: 36, 4>}, {pipeline_mode = #tpu.pipeline_mode<synchronous>, transform_indices = @transform_5, window_bounds = array<i64: 1, 4>}, {pipeline_mode = #tpu.pipeline_mode<synchronous>, transform_indices = @transform_6, window_bounds = array<i64: 1, 4>}, {transform_indices = @transform_7, window_bounds = array<i64: 1, 8, 16, 4>}]} {
    %c0 = arith.constant 0 : index
    %c0_0 = arith.constant 0 : index
    %c0_1 = arith.constant 0 : index
    %c0_2 = arith.constant 0 : index
    %c0_3 = arith.constant 0 : index
    %0 = vector.load %arg2[%c0, %c0_0, %c0_1, %c0_2, %c0_3] : memref<1x1x12x18x4xf32, #tpu.memory_space<vmem>>, vector<1x1x10x16x4xf32>
    %1 = vector.shape_cast %0 : vector<1x1x10x16x4xf32> to vector<10x16x4xf32>
    %2 = vector.shape_cast %1 : vector<10x16x4xf32> to vector<160x4xf32>
    %c0_4 = arith.constant 0 : index
    %c0_5 = arith.constant 0 : index
    %c0_6 = arith.constant 0 : index
    %c1 = arith.constant 1 : index
    %c0_7 = arith.constant 0 : index
    %3 = vector.load %arg2[%c0_4, %c0_5, %c0_6, %c1, %c0_7] : memref<1x1x12x18x4xf32, #tpu.memory_space<vmem>>, vector<1x1x10x16x4xf32>
    %4 = vector.shape_cast %3 : vector<1x1x10x16x4xf32> to vector<10x16x4xf32>
    %5 = vector.shape_cast %4 : vector<10x16x4xf32> to vector<160x4xf32>
    %c0_8 = arith.constant 0 : index
    %c0_9 = arith.constant 0 : index
    %c0_10 = arith.constant 0 : index
    %c2 = arith.constant 2 : index
    %c0_11 = arith.constant 0 : index
    %6 = vector.load %arg2[%c0_8, %c0_9, %c0_10, %c2, %c0_11] : memref<1x1x12x18x4xf32, #tpu.memory_space<vmem>>, vector<1x1x10x16x4xf32>
    %7 = vector.shape_cast %6 : vector<1x1x10x16x4xf32> to vector<10x16x4xf32>
    %8 = vector.shape_cast %7 : vector<10x16x4xf32> to vector<160x4xf32>
    %c0_12 = arith.constant 0 : index
    %c0_13 = arith.constant 0 : index
    %c1_14 = arith.constant 1 : index
    %c0_15 = arith.constant 0 : index
    %c0_16 = arith.constant 0 : index
    %9 = vector.load %arg2[%c0_12, %c0_13, %c1_14, %c0_15, %c0_16] : memref<1x1x12x18x4xf32, #tpu.memory_space<vmem>>, vector<1x1x10x16x4xf32>
    %10 = vector.shape_cast %9 : vector<1x1x10x16x4xf32> to vector<10x16x4xf32>
    %11 = vector.shape_cast %10 : vector<10x16x4xf32> to vector<160x4xf32>
    %c0_17 = arith.constant 0 : index
    %c0_18 = arith.constant 0 : index
    %c1_19 = arith.constant 1 : index
    %c1_20 = arith.constant 1 : index
    %c0_21 = arith.constant 0 : index
    %12 = vector.load %arg2[%c0_17, %c0_18, %c1_19, %c1_20, %c0_21] : memref<1x1x12x18x4xf32, #tpu.memory_space<vmem>>, vector<1x1x10x16x4xf32>
    %13 = vector.shape_cast %12 : vector<1x1x10x16x4xf32> to vector<10x16x4xf32>
    %14 = vector.shape_cast %13 : vector<10x16x4xf32> to vector<160x4xf32>
    %c0_22 = arith.constant 0 : index
    %c0_23 = arith.constant 0 : index
    %c1_24 = arith.constant 1 : index
    %c2_25 = arith.constant 2 : index
    %c0_26 = arith.constant 0 : index
    %15 = vector.load %arg2[%c0_22, %c0_23, %c1_24, %c2_25, %c0_26] : memref<1x1x12x18x4xf32, #tpu.memory_space<vmem>>, vector<1x1x10x16x4xf32>
    %16 = vector.shape_cast %15 : vector<1x1x10x16x4xf32> to vector<10x16x4xf32>
    %17 = vector.shape_cast %16 : vector<10x16x4xf32> to vector<160x4xf32>
    %c0_27 = arith.constant 0 : index
    %c0_28 = arith.constant 0 : index
    %c2_29 = arith.constant 2 : index
    %c0_30 = arith.constant 0 : index
    %c0_31 = arith.constant 0 : index
    %18 = vector.load %arg2[%c0_27, %c0_28, %c2_29, %c0_30, %c0_31] : memref<1x1x12x18x4xf32, #tpu.memory_space<vmem>>, vector<1x1x10x16x4xf32>
    %19 = vector.shape_cast %18 : vector<1x1x10x16x4xf32> to vector<10x16x4xf32>
    %20 = vector.shape_cast %19 : vector<10x16x4xf32> to vector<160x4xf32>
    %c0_32 = arith.constant 0 : index
    %c0_33 = arith.constant 0 : index
    %c2_34 = arith.constant 2 : index
    %c1_35 = arith.constant 1 : index
    %c0_36 = arith.constant 0 : index
    %21 = vector.load %arg2[%c0_32, %c0_33, %c2_34, %c1_35, %c0_36] : memref<1x1x12x18x4xf32, #tpu.memory_space<vmem>>, vector<1x1x10x16x4xf32>
    %22 = vector.shape_cast %21 : vector<1x1x10x16x4xf32> to vector<10x16x4xf32>
    %23 = vector.shape_cast %22 : vector<10x16x4xf32> to vector<160x4xf32>
    %c0_37 = arith.constant 0 : index
    %c0_38 = arith.constant 0 : index
    %c2_39 = arith.constant 2 : index
    %c2_40 = arith.constant 2 : index
    %c0_41 = arith.constant 0 : index
    %24 = vector.load %arg2[%c0_37, %c0_38, %c2_39, %c2_40, %c0_41] : memref<1x1x12x18x4xf32, #tpu.memory_space<vmem>>, vector<1x1x10x16x4xf32>
    %25 = vector.shape_cast %24 : vector<1x1x10x16x4xf32> to vector<10x16x4xf32>
    %26 = vector.shape_cast %25 : vector<10x16x4xf32> to vector<160x4xf32>
    %27 = tpu.concatenate %2, %5, %8, %11, %14, %17, %20, %23, %26 in 1 : vector<160x4xf32>, vector<160x4xf32>, vector<160x4xf32>, vector<160x4xf32>, vector<160x4xf32>, vector<160x4xf32>, vector<160x4xf32>, vector<160x4xf32>, vector<160x4xf32> -> vector<160x36xf32>
    %c0_42 = arith.constant 0 : index
    %c0_43 = arith.constant 0 : index
    %28 = vector.load %arg3[%c0_42, %c0_43] : memref<36x4xf32, #tpu.memory_space<vmem>>, vector<36x4xf32>
    %cst = arith.constant dense<0.000000e+00> : vector<160x4xf32>
    %29 = tpu.matmul %27, %28, %cst {dimension_numbers = #tpu.dot_dimension_numbers<[1], [0], [0], [1], [0, 0, 1, 1], [], []>} : vector<160x36xf32>, vector<36x4xf32>, vector<160x4xf32> -> vector<160x4xf32>
    %c0_44 = arith.constant 0 : index
    %c0_45 = arith.constant 0 : index
    %30 = vector.load %arg4[%c0_44, %c0_45] : memref<1x4xf32, #tpu.memory_space<vmem>>, vector<1x4xf32>
    %31 = vector.broadcast %30 : vector<1x4xf32> to vector<160x4xf32>
    %32 = arith.mulf %29, %31 : vector<160x4xf32>
    %c0_46 = arith.constant 0 : index
    %c0_47 = arith.constant 0 : index
    %33 = vector.load %arg5[%c0_46, %c0_47] : memref<1x4xf32, #tpu.memory_space<vmem>>, vector<1x4xf32>
    %34 = vector.broadcast %33 : vector<1x4xf32> to vector<160x4xf32>
    %35 = arith.addf %32, %34 : vector<160x4xf32>
    %cst_48 = arith.constant 0.000000e+00 : f32
    %36 = vector.broadcast %cst_48 : f32 to vector<160x4xf32>
    %37 = arith.maximumf %35, %36 : vector<160x4xf32>
    %38 = vector.shape_cast %37 : vector<160x4xf32> to vector<10x16x4xf32>
    %c0_49 = arith.constant 0 : index
    %c1_50 = arith.constant 1 : index
    %c0_51 = arith.constant 0 : index
    %39 = vector.load %arg10[%c0_49, %c1_50, %c0_51] : memref<10x18x4xf32, #tpu.memory_space<vmem>>, vector<10x16x4xf32>
    tpu.vector_store %arg10[%c0_49, %c1_50, %c0_51], %38 {strides = array<i32>} : memref<10x18x4xf32, #tpu.memory_space<vmem>>, vector<10x16x4xf32>,
    %cst_52 = arith.constant 0.000000e+00 : f32
    %40 = vector.broadcast %cst_52 : f32 to vector<10x1x4xf32>
    %c0_53 = arith.constant 0 : index
    %c0_54 = arith.constant 0 : index
    %c0_55 = arith.constant 0 : index
    %41 = vector.load %arg10[%c0_53, %c0_54, %c0_55] : memref<10x18x4xf32, #tpu.memory_space<vmem>>, vector<10x1x4xf32>
    tpu.vector_store %arg10[%c0_53, %c0_54, %c0_55], %40 {strides = array<i32>} : memref<10x18x4xf32, #tpu.memory_space<vmem>>, vector<10x1x4xf32>,
    %c0_56 = arith.constant 0 : index
    %c17 = arith.constant 17 : index
    %c0_57 = arith.constant 0 : index
    %42 = vector.load %arg10[%c0_56, %c17, %c0_57] : memref<10x18x4xf32, #tpu.memory_space<vmem>>, vector<10x1x4xf32>
    tpu.vector_store %arg10[%c0_56, %c17, %c0_57], %40 {strides = array<i32>} : memref<10x18x4xf32, #tpu.memory_space<vmem>>, vector<10x1x4xf32>,
    %cst_58 = arith.constant 0.000000e+00 : f32
    %43 = vector.broadcast %cst_58 : f32 to vector<1x18x4xf32>
    %c0_i32 = arith.constant 0 : i32
    %44 = arith.cmpi eq, %arg1, %c0_i32 : i32
    %45 = arith.extui %44 : i1 to i32
    %c0_i32_59 = arith.constant 0 : i32
    %46 = arith.cmpi ne, %45, %c0_i32_59 : i32
    scf.if %46 {
      %c0_105 = arith.constant 0 : index
      %c0_106 = arith.constant 0 : index
      %c0_107 = arith.constant 0 : index
      %87 = vector.load %arg10[%c0_105, %c0_106, %c0_107] : memref<10x18x4xf32, #tpu.memory_space<vmem>>, vector<1x18x4xf32>
      tpu.vector_store %arg10[%c0_105, %c0_106, %c0_107], %43 {strides = array<i32>} : memref<10x18x4xf32, #tpu.memory_space<vmem>>, vector<1x18x4xf32>,
    } else {
    }
    %c1_i32 = arith.constant 1 : i32
    %47 = arith.cmpi eq, %arg1, %c1_i32 : i32
    %48 = arith.extui %47 : i1 to i32
    %c0_i32_60 = arith.constant 0 : i32
    %49 = arith.cmpi ne, %48, %c0_i32_60 : i32
    scf.if %49 {
      %c9 = arith.constant 9 : index
      %c0_105 = arith.constant 0 : index
      %c0_106 = arith.constant 0 : index
      %87 = vector.load %arg10[%c9, %c0_105, %c0_106] : memref<10x18x4xf32, #tpu.memory_space<vmem>>, vector<1x18x4xf32>
      tpu.vector_store %arg10[%c9, %c0_105, %c0_106], %43 {strides = array<i32>} : memref<10x18x4xf32, #tpu.memory_space<vmem>>, vector<1x18x4xf32>,
    } else {
    }
    %c0_61 = arith.constant 0 : index
    %c0_62 = arith.constant 0 : index
    %c0_63 = arith.constant 0 : index
    %50 = vector.load %arg10[%c0_61, %c0_62, %c0_63] : memref<10x18x4xf32, #tpu.memory_space<vmem>>, vector<8x16x4xf32>
    %51 = vector.shape_cast %50 : vector<8x16x4xf32> to vector<128x4xf32>
    %c0_64 = arith.constant 0 : index
    %c1_65 = arith.constant 1 : index
    %c0_66 = arith.constant 0 : index
    %52 = vector.load %arg10[%c0_64, %c1_65, %c0_66] : memref<10x18x4xf32, #tpu.memory_space<vmem>>, vector<8x16x4xf32>
    %53 = vector.shape_cast %52 : vector<8x16x4xf32> to vector<128x4xf32>
    %c0_67 = arith.constant 0 : index
    %c2_68 = arith.constant 2 : index
    %c0_69 = arith.constant 0 : index
    %54 = vector.load %arg10[%c0_67, %c2_68, %c0_69] : memref<10x18x4xf32, #tpu.memory_space<vmem>>, vector<8x16x4xf32>
    %55 = vector.shape_cast %54 : vector<8x16x4xf32> to vector<128x4xf32>
    %c1_70 = arith.constant 1 : index
    %c0_71 = arith.constant 0 : index
    %c0_72 = arith.constant 0 : index
    %56 = vector.load %arg10[%c1_70, %c0_71, %c0_72] : memref<10x18x4xf32, #tpu.memory_space<vmem>>, vector<8x16x4xf32>
    %57 = vector.shape_cast %56 : vector<8x16x4xf32> to vector<128x4xf32>
    %c1_73 = arith.constant 1 : index
    %c1_74 = arith.constant 1 : index
    %c0_75 = arith.constant 0 : index
    %58 = vector.load %arg10[%c1_73, %c1_74, %c0_75] : memref<10x18x4xf32, #tpu.memory_space<vmem>>, vector<8x16x4xf32>
    %59 = vector.shape_cast %58 : vector<8x16x4xf32> to vector<128x4xf32>
    %c1_76 = arith.constant 1 : index
    %c2_77 = arith.constant 2 : index
    %c0_78 = arith.constant 0 : index
    %60 = vector.load %arg10[%c1_76, %c2_77, %c0_78] : memref<10x18x4xf32, #tpu.memory_space<vmem>>, vector<8x16x4xf32>
    %61 = vector.shape_cast %60 : vector<8x16x4xf32> to vector<128x4xf32>
    %c2_79 = arith.constant 2 : index
    %c0_80 = arith.constant 0 : index
    %c0_81 = arith.constant 0 : index
    %62 = vector.load %arg10[%c2_79, %c0_80, %c0_81] : memref<10x18x4xf32, #tpu.memory_space<vmem>>, vector<8x16x4xf32>
    %63 = vector.shape_cast %62 : vector<8x16x4xf32> to vector<128x4xf32>
    %c2_82 = arith.constant 2 : index
    %c1_83 = arith.constant 1 : index
    %c0_84 = arith.constant 0 : index
    %64 = vector.load %arg10[%c2_82, %c1_83, %c0_84] : memref<10x18x4xf32, #tpu.memory_space<vmem>>, vector<8x16x4xf32>
    %65 = vector.shape_cast %64 : vector<8x16x4xf32> to vector<128x4xf32>
    %c2_85 = arith.constant 2 : index
    %c2_86 = arith.constant 2 : index
    %c0_87 = arith.constant 0 : index
    %66 = vector.load %arg10[%c2_85, %c2_86, %c0_87] : memref<10x18x4xf32, #tpu.memory_space<vmem>>, vector<8x16x4xf32>
    %67 = vector.shape_cast %66 : vector<8x16x4xf32> to vector<128x4xf32>
    %68 = tpu.concatenate %51, %53, %55, %57, %59, %61, %63, %65, %67 in 1 : vector<128x4xf32>, vector<128x4xf32>, vector<128x4xf32>, vector<128x4xf32>, vector<128x4xf32>, vector<128x4xf32>, vector<128x4xf32>, vector<128x4xf32>, vector<128x4xf32> -> vector<128x36xf32>
    %c0_88 = arith.constant 0 : index
    %c0_89 = arith.constant 0 : index
    %69 = vector.load %arg6[%c0_88, %c0_89] : memref<36x4xf32, #tpu.memory_space<vmem>>, vector<36x4xf32>
    %cst_90 = arith.constant dense<0.000000e+00> : vector<128x4xf32>
    %70 = tpu.matmul %68, %69, %cst_90 {dimension_numbers = #tpu.dot_dimension_numbers<[1], [0], [0], [1], [0, 0, 1, 1], [], []>} : vector<128x36xf32>, vector<36x4xf32>, vector<128x4xf32> -> vector<128x4xf32>
    %c0_91 = arith.constant 0 : index
    %c0_92 = arith.constant 0 : index
    %71 = vector.load %arg7[%c0_91, %c0_92] : memref<1x4xf32, #tpu.memory_space<vmem>>, vector<1x4xf32>
    %72 = vector.broadcast %71 : vector<1x4xf32> to vector<128x4xf32>
    %73 = arith.mulf %70, %72 : vector<128x4xf32>
    %c0_93 = arith.constant 0 : index
    %c0_94 = arith.constant 0 : index
    %74 = vector.load %arg8[%c0_93, %c0_94] : memref<1x4xf32, #tpu.memory_space<vmem>>, vector<1x4xf32>
    %75 = vector.broadcast %74 : vector<1x4xf32> to vector<128x4xf32>
    %76 = arith.addf %73, %75 : vector<128x4xf32>
    %c0_95 = arith.constant 0 : index
    %c0_96 = arith.constant 0 : index
    %c2_97 = arith.constant 2 : index
    %c1_98 = arith.constant 1 : index
    %c0_99 = arith.constant 0 : index
    %77 = vector.load %arg2[%c0_95, %c0_96, %c2_97, %c1_98, %c0_99] : memref<1x1x12x18x4xf32, #tpu.memory_space<vmem>>, vector<1x1x8x16x4xf32>
    %78 = vector.shape_cast %77 : vector<1x1x8x16x4xf32> to vector<8x16x4xf32>
    %79 = vector.shape_cast %78 : vector<8x16x4xf32> to vector<128x4xf32>
    %80 = arith.addf %76, %79 : vector<128x4xf32>
    %cst_100 = arith.constant 0.000000e+00 : f32
    %81 = vector.broadcast %cst_100 : f32 to vector<128x4xf32>
    %82 = arith.maximumf %80, %81 : vector<128x4xf32>
    %83 = vector.shape_cast %82 : vector<128x4xf32> to vector<8x16x4xf32>
    %c0_101 = arith.constant 0 : index
    %c0_102 = arith.constant 0 : index
    %c0_103 = arith.constant 0 : index
    %c0_104 = arith.constant 0 : index
    %84 = vector.load %arg9[%c0_101, %c0_102, %c0_103, %c0_104] : memref<1x8x16x4xf32, #tpu.memory_space<vmem>>, vector<1x8x16x4xf32>
    %85 = vector.shape_cast %84 : vector<1x8x16x4xf32> to vector<8x16x4xf32>
    %86 = vector.shape_cast %83 : vector<8x16x4xf32> to vector<1x8x16x4xf32>
    tpu.vector_store %arg9[%c0_101, %c0_102, %c0_103, %c0_104], %86 {strides = array<i32>} : memref<1x8x16x4xf32, #tpu.memory_space<vmem>>, vector<1x8x16x4xf32>,
    return
  }
  func.func @transform_0(%arg0: i32, %arg1: i32) -> (i32, i32, i32, i32, i32) {
    %c0_i32 = arith.constant 0 : i32
    %c0_i32_0 = arith.constant 0 : i32
    %c0_i32_1 = arith.constant 0 : i32
    %c0_i32_2 = arith.constant 0 : i32
    return %arg0, %arg1, %c0_i32, %c0_i32_0, %c0_i32_1 : i32, i32, i32, i32, i32
  }
  func.func @transform_1(%arg0: i32, %arg1: i32) -> (i32, i32) {
    %c0_i32 = arith.constant 0 : i32
    %c0_i32_0 = arith.constant 0 : i32
    %c0_i32_1 = arith.constant 0 : i32
    return %c0_i32, %c0_i32_0 : i32, i32
  }
  func.func @transform_2(%arg0: i32, %arg1: i32) -> (i32, i32) {
    %c0_i32 = arith.constant 0 : i32
    %c0_i32_0 = arith.constant 0 : i32
    %c0_i32_1 = arith.constant 0 : i32
    return %c0_i32, %c0_i32_0 : i32, i32
  }
  func.func @transform_3(%arg0: i32, %arg1: i32) -> (i32, i32) {
    %c0_i32 = arith.constant 0 : i32
    %c0_i32_0 = arith.constant 0 : i32
    %c0_i32_1 = arith.constant 0 : i32
    return %c0_i32, %c0_i32_0 : i32, i32
  }
  func.func @transform_4(%arg0: i32, %arg1: i32) -> (i32, i32) {
    %c0_i32 = arith.constant 0 : i32
    %c0_i32_0 = arith.constant 0 : i32
    %c0_i32_1 = arith.constant 0 : i32
    return %c0_i32, %c0_i32_0 : i32, i32
  }
  func.func @transform_5(%arg0: i32, %arg1: i32) -> (i32, i32) {
    %c0_i32 = arith.constant 0 : i32
    %c0_i32_0 = arith.constant 0 : i32
    %c0_i32_1 = arith.constant 0 : i32
    return %c0_i32, %c0_i32_0 : i32, i32
  }
  func.func @transform_6(%arg0: i32, %arg1: i32) -> (i32, i32) {
    %c0_i32 = arith.constant 0 : i32
    %c0_i32_0 = arith.constant 0 : i32
    %c0_i32_1 = arith.constant 0 : i32
    return %c0_i32, %c0_i32_0 : i32, i32
  }
  func.func @transform_7(%arg0: i32, %arg1: i32) -> (i32, i32, i32, i32) {
    %c0_i32 = arith.constant 0 : i32
    %c0_i32_0 = arith.constant 0 : i32
    %c0_i32_1 = arith.constant 0 : i32
    return %arg0, %arg1, %c0_i32, %c0_i32_0 : i32, i32, i32, i32
  }
}

</mosaic_0001>

<bundles_post_ra>
// kernel: basic_block_forward.1
= control target key start
LH: loop header
LB: loop body
LE: loop exit
PB: predicated region body
PF: predicated region fallthrough
CT: control target
= control target key end

     0   :  { %s3343_s24 = smov 0   ;;  %s3345_s25 = smov 0   ;;  %s4652_s0 = inlined_call_operand.vmem [shape: f32[2,2,12,18,4], index: 0, kind: input, shape index: {}]   ;;  %s4653_s1 = inlined_call_operand.vmem [shape: f32[36,4], index: 1, kind: input, shape index: {}]   ;;  %s4654_s2 = inlined_call_operand.vmem [shape: f32[1,4], index: 2, kind: input, shape index: {}]   ;;  %s4655_s3 = inlined_call_operand.vmem [shape: f32[1,4], index: 3, kind: input, shape index: {}]   ;;  %s4656_s4 = inlined_call_operand.vmem [shape: f32[36,4], index: 4, kind: input, shape index: {}]   ;;  %s4657_s5 = inlined_call_operand.vmem [shape: f32[1,4], index: 5, kind: input, shape index: {}]   ;;  %s4658_s6 = inlined_call_operand.vmem [shape: f32[1,4], index: 6, kind: input, shape index: {}]   ;;  %s4659_s7 = inlined_call_operand.vmem [shape: f32[2,16,16,4], index: 7, kind: output, shape index: {}]  }
   0x1   :  { %s3347_s26 = smov 0   ;;  %s3349_s27 = smov 0  }
   0x2   :  { %s3351_s28 = smov 0  }
   0x3 LB: > { %s26_s29 = sadd.s32 1, %s3282_s26  ;;  %s29_s30 = sadd.s32 1, %s3286_s27  ;;  %s3290_s28 = sphi %s3351_s28, %s17_s28   ;;  %s3286_s27 = sphi %s3349_s27, %s4663_s27   ;;  %s3282_s26 = sphi %s3347_s26, %s4662_s26   ;;  %s3278_s25 = sphi %s3345_s25, %s4661_s25   ;;  %s3274_s24 = sphi %s3343_s24, %s4660_s24  }
   0x4   : > { %p27_p0 = scmp.ge.s32.totalorder %s26_s29, 2  ;;  %p2875_p1 = scmp.ge.s32.totalorder %s3290_s28, 1 }
   0x5   : > { %p257_p2 = scmp.lt.s32.totalorder %s3290_s28, 5 }
   0x6   : > { %s4665_s29 = smov (%p27_p0, %s26_s29), 0  ;;  %s4667_s30 = smov (!%p27_p0, %s29_s30), %s3286_s27 }
   0x7   : > { %p258_p3 = pnand %p2875_p1, %p257_p2  ;;  %p31_p4 = scmp.ge.s32.totalorder %s4667_s30, 2 }
   0x8   : > { %p298_p5 = scmp.lt.s32.totalorder (!%p258_p3), %s3278_s25, 1  ;;  %p300_p6 = scmp.lt.s32.totalorder (!%p258_p3), %s3274_s24, 1  ;;  %v1308_v11 = vld [vmem:[%s4653_s1] sm:$0xff] (!%p258_p3)  ;;  %v1309_v12 = vld [vmem:[%s4653_s1 + $0x8] sm:$0xff] (!%p258_p3)  ;;  %v1310_v14 = vld [vmem:[%s4653_s1 + $0x10] sm:$0xff] (!%p258_p3)  ;;  %vm1374_vm0 = vcmask (!%p258_p3), 1043456  }
   0x9   : > { %s4669_s30 = smov (%p31_p4, %s4667_s30), 0  ;;  %261 = sbr.rel (%p258_p3) target bundleno = 1281 (0x501), region = 48 }
   0xa   : > { %s2877_s8 = sshll.u32 (!%p258_p3), %s3274_s24, 3  ;;  %s3297_s16 = smov (!%p258_p3), 24   ;;  %v3183_v13 = vpack.c.bf16 (!%p258_p3), %v1309_v12, %v1308_v11  ;;  %v1311_v15 = vld [vmem:[%s4653_s1 + $0x18] sm:$0xff] (!%p258_p3)  ;;  %v1312_v19 = vld [vmem:[%s4653_s1 + $0x20] sm:$0xf] (!%p258_p3)  ;;  %vm1140_vm1 = vcmask (!%p258_p3), 31744  }
   0xb   : > { %p310_p7 = scmp.lt.s32.totalorder (!%p258_p3), %s2877_s8, 15  ;;  %v3187_v18 = vpack.c.bf16 (!%p258_p3), %v1311_v15, %v1310_v14  ;;  %s3298_s22 = smov (!%p258_p3), 28   ;;  %vm1161_vm2 = vcmask (!%p258_p3), 64512   ;;  %vm1182_vm3 = vcmask (!%p258_p3), 97280   ;;  %vm1203_vm4 = vcmask (!%p258_p3), 130048  }
   0xc   : > { %3184 = vmatprep.subr.bf16.mxu0 (!%p258_p3), %v3183_v13  ;;  %vm1224_vm5 = vcmask (!%p258_p3), 162816   ;;  %vm1245_vm6 = vcmask (!%p258_p3), 195584   ;;  %vm1266_vm7 = vcmask (!%p258_p3), 228352   ;;  %vm1287_vm8 = vcmask (!%p258_p3), 261120   ;;  %p3024_p8 = scmp.ne.s32.totalorder (!%p258_p3), %s3274_s24, 0 }
   0xd   : > { %3186 = vmatpush3.bf16.msra.mxu0 (!%p258_p3), %v3183_v13  ;;  %vm1313_vm9 = vcmask (!%p258_p3), 293888   ;;  %vm1637_vm10 = vcmask (!%p258_p3), 24576  }
   0xe   : > { %3188 = vmatprep.subr.bf16.mxu0 (!%p258_p3), %v3187_v18 }
  0x10   : > { %s4671_s25 = smov (!%p298_p5, %s3278_s25), 1  ;;  %s4673_s8 = smov (!%p310_p7, %s2877_s8), 15 }
  0x11   : > { %s301_s9 = scalar_select %p300_p6, %s3274_s24, 1  ;;  %3190 = vmatpush3.bf16.msra.mxu0 %v3187_v18 }
  0x12   : > { %s3200_s10 = smul.u32 72, %s4671_s25  ;;  %s2879_s12 = sshll.u32 %s4671_s25, 5  ;;  %3117 = vmatprep.subr.msk.mxu0 %vm1374_vm0, %v1312_v19  ;;  %vm1664_vm11 = vcmask (!%p3024_p8), 25600  }
  0x13   : > { %s3199_s11 = smul.u32 36, %s301_s9  ;;  %s2878_s15 = sshll.u32 %s4673_s8, 1 }
  0x14   : > { %s314_s19 = sadd.s32 %s2879_s12, %s2878_s15  ;;  %s3292_s25 = smov 8  }
  0x15   : > { %s304_s13 = sadd.s32 %s3200_s10, %s3199_s11  ;;  %s2880_s20 = sshll.u32 %s314_s19, 3  ;;  %3118 = vmatpush3.msk.msra.mxu0 %vm1374_vm0, %v1312_v19 }
  0x16   : > { %s2876_s14 = sshll.u32 %s304_s13, 3  ;;  %s3388_s23 = scalar_lea.vmem %s4659_s7, %s2880_s20 }
  0x17   : > { %s3381_s18 = scalar_lea.vmem %s4652_s0, %s2876_s14  ;;  %s3293_s8 = smov 4  }
  0x18   : > { %v358_v0 = vld [vmem:[%s3381_s18 + $0x2] sm:$0xff]  ;;  %v359_v2 = vld [vmem:[%s3381_s18 + $0xa] sm:$0xff]  ;;  %v3400_v5 = vld [vmem:[%s3381_s18 + $0x18] sm:$0xff]  ;;  %s3294_s9 = smov 12   ;;  %s3295_s10 = smov 16  }
  0x19   : > { %v338_v1 = vld [vmem:[%s3381_s18 + $0x1] sm:$0xff]  ;;  %600 = vrot.lane.b32.xlu1 %v358_v0, %s3292_s25  ;;  %v339_v3 = vld [vmem:[%s3381_s18 + $0x9] sm:$0xff]  ;;  %v340_v6 = vld [vmem:[%s3381_s18 + $0x19] sm:$0xff]  ;;  %s3296_s11 = smov 20   ;;  %s3299_s14 = smov 32  }
  0x1a   : > { %520 = vrot.lane.b32.xlu0 %v338_v1, %s3293_s8  ;;  %v3397_v4 = vld [vmem:[%s3381_s18 + $0x20] sm:$0xff]  ;;  %v3416_v9 = vld [vmem:[%s3381_s18 + $0x30] sm:$0xff]  ;;  %v3439_v17 = vld [vmem:[%s3381_s18 + $0x38] sm:$0xff] }
  0x1b   : > { %v2921_v7 = vld [vmem:[%s3381_s18 + $0x1a] sm:$0xff]  ;;  %v2922_v10 = vld [vmem:[%s3381_s18 + $0x22] sm:$0xff]  ;;  %v2961_v16 = vld [vmem:[%s3381_s18 + $0x31] sm:$0xff] }
  0x1c   : > { %v2902_v8 = vld [vmem:[%s3381_s18 + $0x21] sm:$0xff]  ;;  %v2981_v20 = vld [vmem:[%s3381_s18 + $0x32] sm:$0xff]  ;;  %v2963_v24 = vld [vmem:[%s3381_s18 + $0x49] sm:$0xff] }
  0x1d   : > { %602 = vrot.lane.b32.xlu1 %v359_v2, %s3292_s25  ;;  %v2962_v21 = vld [vmem:[%s3381_s18 + $0x39] sm:$0xff]  ;;  %v3464_v23 = vld [vmem:[%s3381_s18 + $0x48] sm:$0xff]  ;;  %v3474_v25 = vld [vmem:[%s3381_s18 + $0x50] sm:$0xff] }
  0x1e   : > { %522 = vrot.lane.b32.xlu0 %v339_v3, %s3293_s8  ;;  %v2982_v22 = vld [vmem:[%s3381_s18 + $0x3a] sm:$0xff]  ;;  %v2983_v26 = vld [vmem:[%s3381_s18 + $0x4a] sm:$0xff]  ;;  %v2984_v28 = vld [vmem:[%s3381_s18 + $0x52] sm:$0xff] }
  0x1f   : > { %v2964_v27 = vld [vmem:[%s3381_s18 + $0x51] sm:$0xff]  ;;  %v3494_v29 = vld [vmem:[%s3381_s18 + $0x60] sm:$0xff]  ;;  %v3504_v31 = vld [vmem:[%s3381_s18 + $0x68] sm:$0xff] }
  0x20   : > { %v2965_v30 = vld [vmem:[%s3381_s18 + $0x61] sm:$0xff]  ;;  %v2966_v33 = vld [vmem:[%s3381_s18 + $0x69] sm:$0xff]  ;;  %v3524_v37 = vld [vmem:[%s3381_s18 + $0x78] sm:$0xff] }
  0x21   : > { %682 = vrot.lane.b32.xlu1 %v3397_v4, %s3294_s9  ;;  %v2985_v32 = vld [vmem:[%s3381_s18 + $0x62] sm:$0xff]  ;;  %v2986_v34 = vld [vmem:[%s3381_s18 + $0x6a] sm:$0xff]  ;;  %v2967_v42 = vld [vmem:[%s3381_s18 + $0x79] sm:$0xff] }
  0x22   : > { %680 = vrot.lane.b32.xlu0 %v3400_v5, %s3294_s9  ;;  %v3538_v43 = vld [vmem:[%s3381_s18 + $0x80] sm:$0xff]  ;;  %v3571_v62 = vld [vmem:[%s3381_s18 + $0x90] sm:$0xff]  ;;  %v319_v2 = vld [vmem:[%s3381_s18 + $0x8] sm:$0xff] }
  0x23   : > { %v2987_v48 = vld [vmem:[%s3381_s18 + $0x7a] sm:$0xff]  ;;  %v2988_v54 = vld [vmem:[%s3381_s18 + $0x82] sm:$0xff]  ;;  %v2969_v15 = vld [vmem:[%s3381_s18 + $0x91] sm:$0xff] }
  0x24   : > { %v2968_v49 = vld [vmem:[%s3381_s18 + $0x81] sm:$0xff] }
  0x25   : > { %524 = vrot.lane.b32.xlu1 %v340_v6, %s3293_s8  ;;  %v318_v57 = vld [vmem:[%s3381_s18] sm:$0xff] }
  0x26   : > { %760 = vrot.lane.b32.xlu0 %v340_v6, %s3295_s10 }
  0x29   : > { %840 = vrot.lane.b32.xlu1 %v2921_v7, %s3296_s11 }
  0x2a   : > { %762 = vrot.lane.b32.xlu0 %v2902_v8, %s3295_s10 }
  0x2d   : > { %604 = vrot.lane.b32.xlu1 %v2921_v7, %s3292_s25 }
  0x2e   : > { %526 = vrot.lane.b32.xlu0 %v2902_v8, %s3293_s8 }
  0x31   : > { %920 = vrot.lane.b32.xlu1 %v3416_v9, %s3297_s16 }
  0x32   : > { %842 = vrot.lane.b32.xlu0 %v2922_v10, %s3296_s11 }
  0x35   : > { %684 = vrot.lane.b32.xlu1 %v3416_v9, %s3294_s9 }
  0x36   : > { %606 = vrot.lane.b32.xlu0 %v2922_v10, %s3292_s25 }
  0x39   : > { %1000 = vrot.lane.b32.xlu1 %v2961_v16, %s3298_s22 }
  0x3a   : > { %922 = vrot.lane.b32.xlu0 %v3439_v17, %s3297_s16 }
  0x3d   : > { %764 = vrot.lane.b32.xlu1 %v2961_v16, %s3295_s10 }
  0x3e   : > { %686 = vrot.lane.b32.xlu0 %v3439_v17, %s3294_s9 }
  0x41   : > { %1080 = vrot.lane.b32.xlu1 %v2981_v20, %s3299_s14 }
  0x42   : > { %1002 = vrot.lane.b32.xlu0 %v2962_v21, %s3298_s22 }
  0x45   : > { %766 = vrot.lane.b32.xlu1 %v2962_v21, %s3295_s10 }
  0x46   : > { %528 = vrot.lane.b32.xlu0 %v2961_v16, %s3293_s8  ;;  %v3596_v16 = vld [vmem:[%s3381_s18 + $0x98] sm:$0xff] }
  0x49   : > { %1082 = vrot.lane.b32.xlu1 %v2982_v22, %s3299_s14 }
  0x4a   : > { %844 = vrot.lane.b32.xlu0 %v2981_v20, %s3296_s11 }
  0x4d   : > { %608 = vrot.lane.b32.xlu1 %v2981_v20, %s3292_s25 }
  0x4e   : > { %530 = vrot.lane.b32.xlu0 %v2962_v21, %s3293_s8 }
  0x51   : > { %924 = vrot.lane.b32.xlu1 %v3464_v23, %s3297_s16 }
  0x52   : > { %846 = vrot.lane.b32.xlu0 %v2982_v22, %s3296_s11 }
  0x55   : > { %688 = vrot.lane.b32.xlu1 %v3464_v23, %s3294_s9 }
  0x56   : > { %610 = vrot.lane.b32.xlu0 %v2982_v22, %s3292_s25 }
  0x59   : > { %1004 = vrot.lane.b32.xlu1 %v2963_v24, %s3298_s22 }
  0x5a   : > { %926 = vrot.lane.b32.xlu0 %v3474_v25, %s3297_s16 }
  0x5d   : > { %768 = vrot.lane.b32.xlu1 %v2963_v24, %s3295_s10 }
  0x5e   : > { %690 = vrot.lane.b32.xlu0 %v3474_v25, %s3294_s9 }
  0x61   : > { %1084 = vrot.lane.b32.xlu1 %v2983_v26, %s3299_s14 }
  0x62   : > { %1006 = vrot.lane.b32.xlu0 %v2964_v27, %s3298_s22 }
  0x65   : > { %770 = vrot.lane.b32.xlu1 %v2964_v27, %s3295_s10 }
  0x66   : > { %532 = vrot.lane.b32.xlu0 %v2963_v24, %s3293_s8 }
  0x69   : > { %1086 = vrot.lane.b32.xlu1 %v2984_v28, %s3299_s14 }
  0x6a   : > { %848 = vrot.lane.b32.xlu0 %v2983_v26, %s3296_s11 }
  0x6d   : > { %612 = vrot.lane.b32.xlu1 %v2983_v26, %s3292_s25 }
  0x6e   : > { %534 = vrot.lane.b32.xlu0 %v2964_v27, %s3293_s8 }
  0x71   : > { %928 = vrot.lane.b32.xlu1 %v3494_v29, %s3297_s16 }
  0x72   : > { %850 = vrot.lane.b32.xlu0 %v2984_v28, %s3296_s11 }
  0x75   : > { %692 = vrot.lane.b32.xlu1 %v3494_v29, %s3294_s9 }
  0x76   : > { %614 = vrot.lane.b32.xlu0 %v2984_v28, %s3292_s25 }
  0x79   : > { %1008 = vrot.lane.b32.xlu1 %v2965_v30, %s3298_s22 }
  0x7a   : > { %930 = vrot.lane.b32.xlu0 %v3504_v31, %s3297_s16 }
  0x7d   : > { %772 = vrot.lane.b32.xlu1 %v2965_v30, %s3295_s10 }
  0x7e   : > { %694 = vrot.lane.b32.xlu0 %v3504_v31, %s3294_s9 }
  0x81   : > { %1088 = vrot.lane.b32.xlu1 %v2985_v32, %s3299_s14 }
  0x82   : > { %1010 = vrot.lane.b32.xlu0 %v2966_v33, %s3298_s22 }
  0x85   : > { %774 = vrot.lane.b32.xlu1 %v2966_v33, %s3295_s10 }
  0x86   : > { %536 = vrot.lane.b32.xlu0 %v2965_v30, %s3293_s8 }
  0x89   : > { %1090 = vrot.lane.b32.xlu1 %v2986_v34, %s3299_s14 }
  0x8a   : > { %852 = vrot.lane.b32.xlu0 %v2985_v32, %s3296_s11 }
  0x8b   : > { %v601_v35 = vpop.permute.xlu1 %600 }
  0x8c   : > { %v521_v36 = vpop.permute.xlu0 %520 }
  0x8d   : > { %616 = vrot.lane.b32.xlu1 %v2985_v32, %s3292_s25  ;;  %v1141_v58 = vsel %vm1140_vm1, %v318_v57, %v521_v36  ;;  %v2989_v32 = vld [vmem:[%s3381_s18 + $0x92] sm:$0xff] }
  0x8e   : > { %538 = vrot.lane.b32.xlu0 %v2966_v33, %s3293_s8  ;;  %v1162_v61 = vsel %vm1161_vm2, %v1141_v58, %v601_v35  ;;  %v2970_v33 = vld [vmem:[%s3381_s18 + $0x99] sm:$0xff] }
  0x8f   : > { %v3526_v38 = vpop.permute.xlu1 %602 }
  0x90   : > { %v523_v39 = vpop.permute.xlu0 %522 }
  0x91   : > { %932 = vrot.lane.b32.xlu1 %v3524_v37, %s3297_s16  ;;  %v1142_v8 = vsel %vm1140_vm1, %v319_v2, %v523_v39  ;;  %v2990_v39 = vld [vmem:[%s3381_s18 + $0x9a] sm:$0xff] }
  0x92   : > { %854 = vrot.lane.b32.xlu0 %v2986_v34, %s3296_s11  ;;  %v1163_v14 = vsel %vm1161_vm2, %v1142_v8, %v3526_v38 }
  0x93   : > { %v3531_v40 = vpop.permute.xlu1 %682 }
  0x94   : > { %v681_v41 = vpop.permute.xlu0 %680  ;;  %v1184_v18 = vsel %vm1182_vm3, %v1163_v14, %v3531_v40 }
  0x95   : > { %696 = vrot.lane.b32.xlu1 %v3524_v37, %s3294_s9  ;;  %v1183_v63 = vsel %vm1182_vm3, %v1162_v61, %v681_v41  ;;  %v2971_v61 = vld [vmem:[%s3381_s18 + $0xa9] sm:$0xff] }
  0x96   : > { %618 = vrot.lane.b32.xlu0 %v2986_v34, %s3292_s25 }
  0x97   : > { %v3540_v44 = vpop.permute.xlu1 %524 }
  0x98   : > { %v761_v45 = vpop.permute.xlu0 %760 }
  0x99   : > { %1012 = vrot.lane.b32.xlu1 %v2967_v42, %s3298_s22  ;;  %v1204_v3 = vsel %vm1203_vm4, %v1183_v63, %v761_v45  ;;  %v3665_v63 = vld [vmem:[%s3381_s18 + $0xb0] sm:$0xff] }
  0x9a   : > { %934 = vrot.lane.b32.xlu0 %v3538_v43, %s3297_s16 }
  0x9b   : > { %v841_v46 = vpop.permute.xlu1 %840 }
  0x9c   : > { %v763_v47 = vpop.permute.xlu0 %762  ;;  %v1225_v6 = vsel %vm1224_vm5, %v1204_v3, %v841_v46  ;;  %v1143_v46 = vsel %vm1140_vm1, %v3400_v5, %v3540_v44 }
  0x9d   : > { %776 = vrot.lane.b32.xlu1 %v2967_v42, %s3295_s10  ;;  %v1205_v21 = vsel %vm1203_vm4, %v1184_v18, %v763_v47  ;;  %v2992_v18 = vld [vmem:[%s3381_s18 + $0xb2] sm:$0xff] }
  0x9e   : > { %698 = vrot.lane.b32.xlu0 %v3538_v43, %s3294_s9 }
  0x9f   : > { %v3550_v50 = vpop.permute.xlu1 %604 }
  0xa0   : > { %v3552_v51 = vpop.permute.xlu0 %526  ;;  %v1164_v47 = vsel %vm1161_vm2, %v1143_v46, %v3550_v50  ;;  %v2973_v46 = vld [vmem:[%s3381_s18 + $0xc1] sm:$0xff] }
  0xa1   : > { %1092 = vrot.lane.b32.xlu1 %v2987_v48, %s3299_s14 }
  0xa2   : > { %1014 = vrot.lane.b32.xlu0 %v2968_v49, %s3298_s22 }
  0xa3   : > { %v921_v52 = vpop.permute.xlu1 %920 }
  0xa4   : > { %v843_v53 = vpop.permute.xlu0 %842  ;;  %v1246_v7 = vsel %vm1245_vm6, %v1225_v6, %v921_v52 }
  0xa5   : > { %778 = vrot.lane.b32.xlu1 %v2968_v49, %s3295_s10  ;;  %v1226_v22 = vsel %vm1224_vm5, %v1205_v21, %v843_v53 }
  0xa6   : > { %540 = vrot.lane.b32.xlu0 %v2967_v42, %s3293_s8 }
  0xa7   : > { %v3559_v55 = vpop.permute.xlu1 %684 }
  0xa8   : > { %v3561_v56 = vpop.permute.xlu0 %606 }
  0xa9   : > { %1094 = vrot.lane.b32.xlu1 %v2988_v54, %s3299_s14 }
  0xaa   : > { %856 = vrot.lane.b32.xlu0 %v2987_v48, %s3296_s11 }
  0xab   : > { %v1001_v59 = vpop.permute.xlu1 %1000 }
  0xac   : > { %v923_v60 = vpop.permute.xlu0 %922  ;;  %v1267_v10 = vsel %vm1266_vm7, %v1246_v7, %v1001_v59  ;;  %v1144_v59 = vsel %vm1140_vm1, %v3397_v4, %v3552_v51 }
  0xad   : > { %620 = vrot.lane.b32.xlu1 %v2987_v48, %s3292_s25  ;;  %v1247_v24 = vsel %vm1245_vm6, %v1226_v22, %v923_v60  ;;  %v3639_v48 = vld [vmem:[%s3381_s18 + $0xa8] sm:$0xff]  ;;  %v1165_v60 = vsel %vm1161_vm2, %v1144_v59, %v3561_v56 }
  0xae   : > { %542 = vrot.lane.b32.xlu0 %v2968_v49, %s3293_s8  ;;  %v1185_v49 = vsel %vm1182_vm3, %v1164_v47, %v3559_v55  ;;  %v3733_v47 = vld [vmem:[%s3381_s18 + $0xc8] sm:$0xff] }
  0xaf   : > { %v3574_v0 = vpop.permute.xlu1 %764 }
  0xb0   : > { %v3576_v1 = vpop.permute.xlu0 %686  ;;  %v1206_v5 = vsel %vm1203_vm4, %v1185_v49, %v3574_v0 }
  0xb1   : > { %936 = vrot.lane.b32.xlu1 %v3571_v62, %s3297_s16  ;;  %v1186_v0 = vsel %vm1182_vm3, %v1165_v60, %v3576_v1 }
  0xb2   : > { %858 = vrot.lane.b32.xlu0 %v2988_v54, %s3296_s11 }
  0xb3   : > { %v1081_v11 = vpop.permute.xlu1 %1080 }
  0xb4   : > { %v1003_v12 = vpop.permute.xlu0 %1002  ;;  %v1288_v13 = vsel %vm1287_vm8, %v1267_v10, %v1081_v11  ;;  %v2991_v10 = vld [vmem:[%s3381_s18 + $0xaa] sm:$0xff] }
  0xb5   : > { %700 = vrot.lane.b32.xlu1 %v3571_v62, %s3294_s9  ;;  %3119 = vmatprep.mubr.msk.f32.mxu0 %vm1313_vm9, %v1288_v13  ;;  %v1268_v26 = vsel %vm1266_vm7, %v1247_v24, %v1003_v12  ;;  %v2972_v11 = vld [vmem:[%s3381_s18 + $0xb1] sm:$0xff] }
  0xb6   : > { %622 = vrot.lane.b32.xlu0 %v2988_v54, %s3292_s25 }
  0xb7   : > { %v767_v19 = vpop.permute.xlu1 %766 }
  0xb8   : > { %v3600_v20 = vpop.permute.xlu0 %528  ;;  %v1207_v51 = vsel %vm1203_vm4, %v1186_v0, %v767_v19  ;;  %v2994_v0 = vld [vmem:[%s3381_s18 + $0xca] sm:$0xff] }
  0xb9   : > { %1016 = vrot.lane.b32.xlu1 %v2969_v15, %s3298_s22 }
  0xba   : > { %938 = vrot.lane.b32.xlu0 %v3596_v16, %s3297_s16 }
  0xbb   : > { %v1083_v27 = vpop.permute.xlu1 %1082 }
  0xbc   : > { %v845_v28 = vpop.permute.xlu0 %844  ;;  %v1289_v30 = vsel %vm1287_vm8, %v1268_v26, %v1083_v27  ;;  %v1145_v26 = vsel %vm1140_vm1, %v3416_v9, %v3600_v20 }
  0xbd   : > { %780 = vrot.lane.b32.xlu1 %v2969_v15, %s3295_s10  ;;  %3120 = vmatmul.mubr.msk.f32.vlgmr.msra.gmra.mrb[0].mxu0 %vm1313_vm9, %v1289_v30  ;;  %v1227_v44 = vsel %vm1224_vm5, %v1206_v5, %v845_v28  ;;  %v3708_v28 = vld [vmem:[%s3381_s18 + $0xc0] sm:$0xff] }
  0xbe   : > { %702 = vrot.lane.b32.xlu0 %v3596_v16, %s3294_s9 }
  0xbf   : > { %v3616_v34 = vpop.permute.xlu1 %608 }
  0xc0   : > { %v3618_v35 = vpop.permute.xlu0 %530  ;;  %v1166_v27 = vsel %vm1161_vm2, %v1145_v26, %v3616_v34  ;;  %v2975_v26 = vld [vmem:[%s3381_s18 + $0xd9] sm:$0xff] }
  0xc1   : > { %1096 = vrot.lane.b32.xlu1 %v2989_v32, %s3299_s14 }
  0xc2   : > { %1018 = vrot.lane.b32.xlu0 %v2970_v33, %s3298_s22 }
  0xc3   : > { %v925_v36 = vpop.permute.xlu1 %924 }
  0xc4   : > { %v847_v38 = vpop.permute.xlu0 %846  ;;  %v1248_v50 = vsel %vm1245_vm6, %v1227_v44, %v925_v36 }
  0xc5   : > { %782 = vrot.lane.b32.xlu1 %v2970_v33, %s3295_s10  ;;  %v1228_v3 = vsel %vm1224_vm5, %v1207_v51, %v847_v38 }
  0xc6   : > { %544 = vrot.lane.b32.xlu0 %v2969_v15, %s3293_s8 }
  0xc7   : > { %v3625_v40 = vpop.permute.xlu1 %688 }
  0xc8   : > { %v3627_v41 = vpop.permute.xlu0 %610  ;;  %v1187_v30 = vsel %vm1182_vm3, %v1166_v27, %v3625_v40  ;;  %v3801_v27 = vld [vmem:[%s3381_s18 + $0xe0] sm:$0xff] }
  0xc9   : > { %1098 = vrot.lane.b32.xlu1 %v2990_v39, %s3299_s14 }
  0xca   : > { %860 = vrot.lane.b32.xlu0 %v2989_v32, %s3296_s11 }
  0xcb   : > { %v1005_v42 = vpop.permute.xlu1 %1004 }
  0xcc   : > { %v927_v45 = vpop.permute.xlu0 %926  ;;  %v1269_v54 = vsel %vm1266_vm7, %v1248_v50, %v1005_v42  ;;  %v1146_v42 = vsel %vm1140_vm1, %v3439_v17, %v3618_v35 }
  0xcd   : > { %624 = vrot.lane.b32.xlu1 %v2989_v32, %s3292_s25  ;;  %v1249_v56 = vsel %vm1245_vm6, %v1228_v3, %v927_v45  ;;  %v1167_v45 = vsel %vm1161_vm2, %v1146_v42, %v3627_v41 }
  0xce   : > { %546 = vrot.lane.b32.xlu0 %v2970_v33, %s3293_s8 }
  0xcf   : > { %v769_v52 = vpop.permute.xlu1 %768 }
  0xd0   : > { %v3643_v53 = vpop.permute.xlu0 %690  ;;  %v1208_v36 = vsel %vm1203_vm4, %v1187_v30, %v769_v52 }
  0xd1   : > { %940 = vrot.lane.b32.xlu1 %v3639_v48, %s3297_s16  ;;  %v1188_v49 = vsel %vm1182_vm3, %v1167_v45, %v3643_v53 }
  0xd2   : > { %862 = vrot.lane.b32.xlu0 %v2990_v39, %s3296_s11 }
  0xd3   : > { %v1085_v55 = vpop.permute.xlu1 %1084 }
  0xd4   : > { %v1007_v57 = vpop.permute.xlu0 %1006  ;;  %v1290_v58 = vsel %vm1287_vm8, %v1269_v54, %v1085_v55  ;;  %v2993_v55 = vld [vmem:[%s3381_s18 + $0xc2] sm:$0xff] }
  0xd5   : > { %704 = vrot.lane.b32.xlu1 %v3639_v48, %s3294_s9  ;;  %3122 = vmatprep.mubr.msk.f32.mxu0 %vm1313_vm9, %v1290_v58  ;;  %v1270_v6 = vsel %vm1266_vm7, %v1249_v56, %v1007_v57  ;;  %v2974_v57 = vld [vmem:[%s3381_s18 + $0xc9] sm:$0xff] }
  0xd6   : > { %626 = vrot.lane.b32.xlu0 %v2990_v39, %s3292_s25 }
  0xd7   : > { %v771_v2 = vpop.permute.xlu1 %770 }
  0xd8   : > { %v3669_v4 = vpop.permute.xlu0 %532  ;;  %v1209_v35 = vsel %vm1203_vm4, %v1188_v49, %v771_v2  ;;  %v2996_v49 = vld [vmem:[%s3381_s18 + $0xe2] sm:$0xff] }
  0xd9   : > { %1020 = vrot.lane.b32.xlu1 %v2971_v61, %s3298_s22 }
  0xda   : > { %942 = vrot.lane.b32.xlu0 %v3665_v63, %s3297_s16 }
  0xdb   : > { %v1087_v7 = vpop.permute.xlu1 %1086 }
  0xdc   : > { %v849_v1 = vpop.permute.xlu0 %848  ;;  %v1291_v8 = vsel %vm1287_vm8, %v1270_v6, %v1087_v7  ;;  %v1147_v6 = vsel %vm1140_vm1, %v3464_v23, %v3669_v4 }
  0xdd   : > { %784 = vrot.lane.b32.xlu1 %v2971_v61, %s3295_s10  ;;  %3123 = vmatmul.mubr.msk.f32.gmra.mrb[2].mxu0 %vm1313_vm9, %v1291_v8  ;;  %v1229_v9 = vsel %vm1224_vm5, %v1208_v36, %v849_v1  ;;  %v3776_v1 = vld [vmem:[%s3381_s18 + $0xd8] sm:$0xff] }
  0xde   : > { %706 = vrot.lane.b32.xlu0 %v3665_v63, %s3294_s9 }
  0xdf   : > { %v3685_v12 = vpop.permute.xlu1 %612 }
  0xe0   : > { %v3687_v13 = vpop.permute.xlu0 %534  ;;  %v1168_v7 = vsel %vm1161_vm2, %v1147_v6, %v3685_v12  ;;  %v2977_v6 = vld [vmem:[%s3381_s18 + $0xf1] sm:$0xff] }
  0xe1   : > { %1100 = vrot.lane.b32.xlu1 %v2991_v10, %s3299_s14 }
  0xe2   : > { %1022 = vrot.lane.b32.xlu0 %v2972_v11, %s3298_s22 }
  0xe3   : > { %v929_v14 = vpop.permute.xlu1 %928 }
  0xe4   : > { %v851_v15 = vpop.permute.xlu0 %850  ;;  %v1250_v20 = vsel %vm1245_vm6, %v1229_v9, %v929_v14 }
  0xe5   : > { %786 = vrot.lane.b32.xlu1 %v2972_v11, %s3295_s10  ;;  %v1230_v5 = vsel %vm1224_vm5, %v1209_v35, %v851_v15 }
  0xe6   : > { %548 = vrot.lane.b32.xlu0 %v2971_v61, %s3293_s8 }
  0xe7   : > { %v3694_v19 = vpop.permute.xlu1 %692 }
  0xe8   : > { %v3696_v21 = vpop.permute.xlu0 %614  ;;  %v1189_v8 = vsel %vm1182_vm3, %v1168_v7, %v3694_v19  ;;  %v2958_v7 = vld [vmem:[%s3381_s18 + $0xf8] sm:$0xff] }
  0xe9   : > { %1102 = vrot.lane.b32.xlu1 %v2992_v18, %s3299_s14 }
  0xea   : > { %864 = vrot.lane.b32.xlu0 %v2991_v10, %s3296_s11 }
  0xeb   : > { %v1009_v22 = vpop.permute.xlu1 %1008 }
  0xec   : > { %v931_v24 = vpop.permute.xlu0 %930  ;;  %v1271_v34 = vsel %vm1266_vm7, %v1250_v20, %v1009_v22  ;;  %v1148_v22 = vsel %vm1140_vm1, %v3474_v25, %v3687_v13 }
  0xed   : > { %628 = vrot.lane.b32.xlu1 %v2991_v10, %s3292_s25  ;;  %v1251_v41 = vsel %vm1245_vm6, %v1230_v5, %v931_v24  ;;  %v1169_v24 = vsel %vm1161_vm2, %v1148_v22, %v3696_v21 }
  0xee   : > { %550 = vrot.lane.b32.xlu0 %v2972_v11, %s3293_s8 }
  0xef   : > { %v773_v32 = vpop.permute.xlu1 %772 }
  0xf0   : > { %v3712_v33 = vpop.permute.xlu0 %694  ;;  %v1210_v14 = vsel %vm1203_vm4, %v1189_v8, %v773_v32 }
  0xf1   : > { %944 = vrot.lane.b32.xlu1 %v3708_v28, %s3297_s16  ;;  %v1190_v30 = vsel %vm1182_vm3, %v1169_v24, %v3712_v33 }
  0xf2   : > { %866 = vrot.lane.b32.xlu0 %v2992_v18, %s3296_s11 }
  0xf3   : > { %v1089_v38 = vpop.permute.xlu1 %1088 }
  0xf4   : > { %v1011_v39 = vpop.permute.xlu0 %1010  ;;  %v1292_v40 = vsel %vm1287_vm8, %v1271_v34, %v1089_v38  ;;  %v2995_v38 = vld [vmem:[%s3381_s18 + $0xda] sm:$0xff] }
  0xf5   : > { %708 = vrot.lane.b32.xlu1 %v3708_v28, %s3294_s9  ;;  %3125 = vmatprep.mubr.msk.f32.mxu0 %vm1313_vm9, %v1292_v40  ;;  %v1272_v44 = vsel %vm1266_vm7, %v1251_v41, %v1011_v39  ;;  %v2976_v39 = vld [vmem:[%s3381_s18 + $0xe1] sm:$0xff] }
  0xf6   : > { %630 = vrot.lane.b32.xlu0 %v2992_v18, %s3292_s25 }
  0xf7   : > { %v775_v52 = vpop.permute.xlu1 %774 }
  0xf8   : > { %v3737_v17 = vpop.permute.xlu0 %536  ;;  %v1211_v13 = vsel %vm1203_vm4, %v1190_v30, %v775_v52  ;;  %v2940_v30 = vld [vmem:[%s3381_s18 + $0xfa] sm:$0xff] }
  0xf9   : > { %1024 = vrot.lane.b32.xlu1 %v2973_v46, %s3298_s22 }
  0xfa   : > { %946 = vrot.lane.b32.xlu0 %v3733_v47, %s3297_s16 }
  0xfb   : > { %v1091_v50 = vpop.permute.xlu1 %1090 }
  0xfc   : > { %v853_v53 = vpop.permute.xlu0 %852  ;;  %v1293_v54 = vsel %vm1287_vm8, %v1272_v44, %v1091_v50  ;;  %v1149_v44 = vsel %vm1140_vm1, %v3494_v29, %v3737_v17 }
  0xfd   : > { %788 = vrot.lane.b32.xlu1 %v2973_v46, %s3295_s10  ;;  %3126 = vmatmul.mubr.msk.f32.gmra.mrb[4].mxu0 %vm1313_vm9, %v1293_v54  ;;  %v1231_v23 = vsel %vm1224_vm5, %v1210_v14, %v853_v53  ;;  %v2957_v53 = vld [vmem:[%s3381_s18 + $0xf0] sm:$0xff] }
  0xfe   : > { %710 = vrot.lane.b32.xlu0 %v3733_v47, %s3294_s9 }
  0xff   : > { %v3753_v58 = vpop.permute.xlu1 %616 }
 0x100   : > { %v3755_v59 = vpop.permute.xlu0 %538  ;;  %v1170_v50 = vsel %vm1161_vm2, %v1149_v44, %v3753_v58  ;;  %v2999_v44 = vld [vmem:[%s3381_s18 + $0x10a] sm:$0xff] }
 0x101   : > { %1104 = vrot.lane.b32.xlu1 %v2993_v55, %s3299_s14 }
 0x102   : > { %1026 = vrot.lane.b32.xlu0 %v2974_v57, %s3298_s22 }
 0x103   : > { %v933_v60 = vpop.permute.xlu1 %932 }
 0x104   : > { %v855_v61 = vpop.permute.xlu0 %854  ;;  %v1252_v4 = vsel %vm1245_vm6, %v1231_v23, %v933_v60 }
 0x105   : > { %790 = vrot.lane.b32.xlu1 %v2974_v57, %s3295_s10  ;;  %v1232_v36 = vsel %vm1224_vm5, %v1211_v13, %v855_v61 }
 0x106   : > { %552 = vrot.lane.b32.xlu0 %v2973_v46, %s3293_s8 }
 0x107   : > { %v3762_v2 = vpop.permute.xlu1 %696 }
 0x108   : > { %v3764_v51 = vpop.permute.xlu0 %618  ;;  %v1191_v54 = vsel %vm1182_vm3, %v1170_v50, %v3762_v2 }
 0x109   : > { %1106 = vrot.lane.b32.xlu1 %v2994_v0, %s3299_s14 }
 0x10a   : > { %868 = vrot.lane.b32.xlu0 %v2993_v55, %s3296_s11 }
 0x10b   : > { %v1013_v3 = vpop.permute.xlu1 %1012 }
 0x10c   : > { %v935_v56 = vpop.permute.xlu0 %934  ;;  %v1273_v12 = vsel %vm1266_vm7, %v1252_v4, %v1013_v3  ;;  %v1150_v3 = vsel %vm1140_vm1, %v3504_v31, %v3755_v59 }
 0x10d   : > { %632 = vrot.lane.b32.xlu1 %v2993_v55, %s3292_s25  ;;  %v1253_v21 = vsel %vm1245_vm6, %v1232_v36, %v935_v56  ;;  %v1171_v56 = vsel %vm1161_vm2, %v1150_v3, %v3764_v51  ;;  %v2960_v36 = vld [vmem:[%s3381_s18 + $0x110] sm:$0xff] }
 0x10e   : > { %554 = vrot.lane.b32.xlu0 %v2974_v57, %s3293_s8 }
 0x10f   : > { %v777_v10 = vpop.permute.xlu1 %776 }
 0x110   : > { %v3780_v11 = vpop.permute.xlu0 %698  ;;  %v1212_v60 = vsel %vm1203_vm4, %v1191_v54, %v777_v10 }
 0x111   : > { %948 = vrot.lane.b32.xlu1 %v3776_v1, %s3297_s16  ;;  %v1192_v8 = vsel %vm1182_vm3, %v1171_v56, %v3780_v11 }
 0x112   : > { %870 = vrot.lane.b32.xlu0 %v2994_v0, %s3296_s11 }
 0x113   : > { %v1093_v15 = vpop.permute.xlu1 %1092 }
 0x114   : > { %v1015_v18 = vpop.permute.xlu0 %1014  ;;  %v1294_v19 = vsel %vm1287_vm8, %v1273_v12, %v1093_v15  ;;  %v2997_v15 = vld [vmem:[%s3381_s18 + $0xf2] sm:$0xff] }
 0x115   : > { %712 = vrot.lane.b32.xlu1 %v3776_v1, %s3294_s9  ;;  %3128 = vmatprep.mubr.msk.f32.mxu0 %vm1313_vm9, %v1294_v19  ;;  %v1274_v9 = vsel %vm1266_vm7, %v1253_v21, %v1015_v18  ;;  %v2978_v18 = vld [vmem:[%s3381_s18 + $0xf9] sm:$0xff]  ;;  %v2959_v21 = vld [vmem:[%s3381_s18 + $0x108] sm:$0xff] }
 0x116   : > { %634 = vrot.lane.b32.xlu0 %v2994_v0, %s3292_s25 }
 0x117   : > { %v779_v32 = vpop.permute.xlu1 %778 }
 0x118   : > { %v3805_v25 = vpop.permute.xlu0 %540  ;;  %v1213_v31 = vsel %vm1203_vm4, %v1192_v8, %v779_v32 }
 0x119   : > { %1028 = vrot.lane.b32.xlu1 %v2975_v26, %s3298_s22 }
 0x11a   : > { %950 = vrot.lane.b32.xlu0 %v3801_v27, %s3297_s16 }
 0x11b   : > { %v1095_v20 = vpop.permute.xlu1 %1094 }
 0x11c   : > { %v857_v33 = vpop.permute.xlu0 %856  ;;  %v1295_v34 = vsel %vm1287_vm8, %v1274_v9, %v1095_v20 }
 0x11d   : > { %792 = vrot.lane.b32.xlu1 %v2975_v26, %s3295_s10  ;;  %3129 = vmatmul.mubr.msk.f32.gmra.mrb[6].mxu0 %vm1313_vm9, %v1295_v34  ;;  %v1233_v29 = vsel %vm1224_vm5, %v1212_v60, %v857_v33  ;;  %v1151_v33 = vsel %vm1140_vm1, %v3524_v37, %v3805_v25  ;;  %v3000_v25 = vld [vmem:[%s3381_s18 + $0x112] sm:$0xff] }
 0x11e   : > { %714 = vrot.lane.b32.xlu0 %v3801_v27, %s3294_s9 }
 0x11f   : > { %v3821_v40 = vpop.permute.xlu1 %620 }
 0x120   : > { %v3823_v42 = vpop.permute.xlu0 %542  ;;  %v1172_v34 = vsel %vm1161_vm2, %v1151_v33, %v3821_v40 }
 0x121   : > { %1108 = vrot.lane.b32.xlu1 %v2995_v38, %s3299_s14  ;;  %v1152_v54 = vsel %vm1140_vm1, %v3538_v43, %v3823_v42 }
 0x122   : > { %1030 = vrot.lane.b32.xlu0 %v2976_v39, %s3298_s22 }
 0x123   : > { %v937_v45 = vpop.permute.xlu1 %936 }
 0x124   : > { %v859_v46 = vpop.permute.xlu0 %858  ;;  %v1254_v17 = vsel %vm1245_vm6, %v1233_v29, %v937_v45 }
 0x125   : > { %794 = vrot.lane.b32.xlu1 %v2976_v39, %s3295_s10  ;;  %v1234_v59 = vsel %vm1224_vm5, %v1213_v31, %v859_v46 }
 0x126   : > { %556 = vrot.lane.b32.xlu0 %v2975_v26, %s3293_s8 }
 0x127   : > { %v3830_v52 = vpop.permute.xlu1 %700 }
 0x128   : > { %v3832_v35 = vpop.permute.xlu0 %622  ;;  %v1193_v45 = vsel %vm1182_vm3, %v1172_v34, %v3830_v52 }
 0x129   : > { %1110 = vrot.lane.b32.xlu1 %v2996_v49, %s3299_s14 }
 0x12a   : > { %872 = vrot.lane.b32.xlu0 %v2995_v38, %s3296_s11 }
 0x12b   : > { %v1017_v5 = vpop.permute.xlu1 %1016 }
 0x12c   : > { %v939_v41 = vpop.permute.xlu0 %938  ;;  %v1275_v58 = vsel %vm1266_vm7, %v1254_v17, %v1017_v5 }
 0x12d   : > { %636 = vrot.lane.b32.xlu1 %v2995_v38, %s3292_s25  ;;  %v1255_v51 = vsel %vm1245_vm6, %v1234_v59, %v939_v41  ;;  %v2980_v38 = vld [vmem:[%s3381_s18 + $0x111] sm:$0xff] }
 0x12e   : > { %558 = vrot.lane.b32.xlu0 %v2976_v39, %s3293_s8  ;;  %v2979_v39 = vld [vmem:[%s3381_s18 + $0x109] sm:$0xff] }
 0x12f   : > { %v781_v55 = vpop.permute.xlu1 %780 }
 0x130   : > { %v3846_v57 = vpop.permute.xlu0 %702  ;;  %v1214_v5 = vsel %vm1203_vm4, %v1193_v45, %v781_v55  ;;  %v1173_v55 = vsel %vm1161_vm2, %v1152_v54, %v3832_v35 }
 0x131   : > { %952 = vrot.lane.b32.xlu1 %v2957_v53, %s3297_s16  ;;  %v1194_v60 = vsel %vm1182_vm3, %v1173_v55, %v3846_v57 }
 0x132   : > { %874 = vrot.lane.b32.xlu0 %v2996_v49, %s3296_s11 }
 0x133   : > { %v1097_v61 = vpop.permute.xlu1 %1096 }
 0x134   : > { %v1019_v0 = vpop.permute.xlu0 %1018  ;;  %v1296_v2 = vsel %vm1287_vm8, %v1275_v58, %v1097_v61 }
 0x135   : > { %716 = vrot.lane.b32.xlu1 %v2957_v53, %s3294_s9  ;;  %3131 = vmatprep.mubr.msk.f32.mxu0 %vm1313_vm9, %v1296_v2  ;;  %v1276_v23 = vsel %vm1266_vm7, %v1255_v51, %v1019_v0 }
 0x136   : > { %638 = vrot.lane.b32.xlu0 %v2996_v49, %s3292_s25 }
 0x137   : > { %v783_v10 = vpop.permute.xlu1 %782 }
 0x138   : > { %v3867_v14 = vpop.permute.xlu0 %544  ;;  %v1215_v58 = vsel %vm1203_vm4, %v1194_v60, %v783_v10 }
 0x139   : > { %1032 = vrot.lane.b32.xlu1 %v2977_v6, %s3298_s22  ;;  %v1153_v59 = vsel %vm1140_vm1, %v3571_v62, %v3867_v14 }
 0x13a   : > { %954 = vrot.lane.b32.xlu0 %v2958_v7, %s3297_s16 }
 0x13b   : > { %v1099_v4 = vpop.permute.xlu1 %1098 }
 0x13c   : > { %v861_v12 = vpop.permute.xlu0 %860  ;;  %v1297_v11 = vsel %vm1287_vm8, %v1276_v23, %v1099_v4 }
 0x13d   : > { %796 = vrot.lane.b32.xlu1 %v2977_v6, %s3295_s10  ;;  %3132 = vmatmul.mubr.msk.f32.gmra.mrb[8].mxu0 %vm1313_vm9, %v1297_v11  ;;  %v1235_v41 = vsel %vm1224_vm5, %v1214_v5, %v861_v12 }
 0x13e   : > { %718 = vrot.lane.b32.xlu0 %v2958_v7, %s3294_s9 }
 0x13f   : > { %v3881_v19 = vpop.permute.xlu1 %624 }
 0x140   : > { %v3883_v22 = vpop.permute.xlu0 %546  ;;  %v1174_v51 = vsel %vm1161_vm2, %v1153_v59, %v3881_v19 }
 0x141   : > { %1112 = vrot.lane.b32.xlu1 %v2997_v15, %s3299_s14  ;;  %v1154_v62 = vsel %vm1140_vm1, %v3596_v16, %v3883_v22 }
 0x142   : > { %1034 = vrot.lane.b32.xlu0 %v2978_v18, %s3298_s22 }
 0x143   : > { %v941_v24 = vpop.permute.xlu1 %940 }
 0x144   : > { %v863_v26 = vpop.permute.xlu0 %862  ;;  %v1256_v37 = vsel %vm1245_vm6, %v1235_v41, %v941_v24 }
 0x145   : > { %876 = vrot.lane.b32.xlu1 %v2997_v15, %s3296_s11  ;;  %v1236_v61 = vsel %vm1224_vm5, %v1215_v58, %v863_v26 }
 0x146   : > { %798 = vrot.lane.b32.xlu0 %v2978_v18, %s3295_s10 }
 0x147   : > { %v705_v32 = vpop.permute.xlu1 %704 }
 0x148   : > { %v3890_v13 = vpop.permute.xlu0 %626  ;;  %v1195_v23 = vsel %vm1182_vm3, %v1174_v51, %v705_v32 }
 0x149   : > { %878 = vrot.lane.b32.xlu1 %v2940_v30, %s3296_s11  ;;  %v1175_v14 = vsel %vm1161_vm2, %v1154_v62, %v3890_v13 }
 0x14a   : > { %1114 = vrot.lane.b32.xlu0 %v2940_v30, %s3299_s14 }
 0x14b   : > { %v1021_v9 = vpop.permute.xlu1 %1020 }
 0x14c   : > { %v943_v20 = vpop.permute.xlu0 %942  ;;  %v1277_v40 = vsel %vm1266_vm7, %v1256_v37, %v1021_v9 }
 0x14d   : > { %958 = vrot.lane.b32.xlu1 %v2960_v36, %s3297_s16  ;;  %v1257_v43 = vsel %vm1245_vm6, %v1236_v61, %v943_v20 }
 0x14e   : > { %956 = vrot.lane.b32.xlu0 %v2959_v21, %s3297_s16 }
 0x14f   : > { %v785_v46 = vpop.permute.xlu1 %784 }
 0x150   : > { %v707_v49 = vpop.permute.xlu0 %706  ;;  %v1216_v11 = vsel %vm1203_vm4, %v1195_v23, %v785_v46 }
 0x151   : > { %1038 = vrot.lane.b32.xlu1 %v2980_v38, %s3298_s22  ;;  %v1196_v19 = vsel %vm1182_vm3, %v1175_v14, %v707_v49 }
 0x152   : > { %1036 = vrot.lane.b32.xlu0 %v2979_v39, %s3298_s22 }
 0x153   : > { %v1101_v50 = vpop.permute.xlu1 %1100 }
 0x154   : > { %v1023_v53 = vpop.permute.xlu0 %1022  ;;  %v1298_v52 = vsel %vm1287_vm8, %v1277_v40, %v1101_v50 }
 0x155   : > { %1118 = vrot.lane.b32.xlu1 %v3000_v25, %s3299_s14  ;;  %3134 = vmatprep.mubr.msk.f32.mxu0 %vm1313_vm9, %v1298_v52  ;;  %v1278_v42 = vsel %vm1266_vm7, %v1257_v43, %v1023_v53  ;;  %v3971_v52 = vld [vmem:[%s4654_s2] ss:$0 sm:$0xff] }
 0x156   : > { %1116 = vrot.lane.b32.xlu0 %v2999_v44, %s3299_s14 }
 0x157   : > { %v787_v29 = vpop.permute.xlu1 %786 }
 0x158   : > { %v549_v17 = vpop.permute.xlu0 %548  ;;  %v1217_v9 = vsel %vm1203_vm4, %v1196_v19, %v787_v29 }
 0x159   : > { %v1155_v25 = vsel %vm1140_vm1, %v3639_v48, %v549_v17  ;;  %v3978_v48 = vld [vmem:[%s4655_s3] ss:$0 sm:$0xff] }
 0x15b   : > { %v1103_v0 = vpop.permute.xlu1 %1102 }
 0x15c   : > { %v865_v2 = vpop.permute.xlu0 %864  ;;  %v1299_v3 = vsel %vm1287_vm8, %v1278_v42, %v1103_v0 }
 0x15d   : > { %3135 = vmatmul.mubr.msk.f32.gmra.mrb[10].mxu0 %vm1313_vm9, %v1299_v3  ;;  %v1237_v15 = vsel %vm1224_vm5, %v1216_v11, %v865_v2 }
 0x15f   : > { %v629_v35 = vpop.permute.xlu1 %628 }
 0x160   : > { %v551_v56 = vpop.permute.xlu0 %550  ;;  %v1176_v44 = vsel %vm1161_vm2, %v1155_v25, %v629_v35 }
 0x161   : > { %v1156_v35 = vsel %vm1140_vm1, %v3665_v63, %v551_v56 }
 0x163   : > { %v945_v6 = vpop.permute.xlu1 %944 }
 0x164   : > { %v867_v57 = vpop.permute.xlu0 %866  ;;  %v1258_v18 = vsel %vm1245_vm6, %v1237_v15, %v945_v6 }
 0x165   : > { %v1238_v20 = vsel %vm1224_vm5, %v1217_v9, %v867_v57 }
 0x167   : > { %v709_v7 = vpop.permute.xlu1 %708 }
 0x168   : > { %v631_v8 = vpop.permute.xlu0 %630  ;;  %v1197_v40 = vsel %vm1182_vm3, %v1176_v44, %v709_v7 }
 0x169   : > { %v1177_v57 = vsel %vm1161_vm2, %v1156_v35, %v631_v8 }
 0x16b   : > { %v1025_v31 = vpop.permute.xlu1 %1024 }
 0x16c   : > { %v947_v10 = vpop.permute.xlu0 %946  ;;  %v1279_v24 = vsel %vm1266_vm7, %v1258_v18, %v1025_v31 }
 0x16d   : > { %v1259_v33 = vsel %vm1245_vm6, %v1238_v20, %v947_v10 }
 0x16f   : > { %v789_v4 = vpop.permute.xlu1 %788 }
 0x170   : > { %v711_v12 = vpop.permute.xlu0 %710  ;;  %v1218_v54 = vsel %vm1203_vm4, %v1197_v40, %v789_v4 }
 0x171   : > { %v1198_v31 = vsel %vm1182_vm3, %v1177_v57, %v711_v12 }
 0x173   : > { %v1105_v26 = vpop.permute.xlu1 %1104 }
 0x174   : > { %v1027_v30 = vpop.permute.xlu0 %1026  ;;  %v1300_v36 = vsel %vm1287_vm8, %v1279_v24, %v1105_v26 }
 0x175   : > { %3137 = vmatprep.mubr.msk.f32.mxu0 %vm1313_vm9, %v1300_v36  ;;  %v1280_v34 = vsel %vm1266_vm7, %v1259_v33, %v1027_v30 }
 0x177   : > { %v791_v32 = vpop.permute.xlu1 %790 }
 0x178   : > { %v3950_v21 = vpop.permute.xlu0 %552  ;;  %v1219_v23 = vsel %vm1203_vm4, %v1198_v31, %v791_v32 }
 0x179   : > { %v1157_v19 = vsel %vm1140_vm1, %v3708_v28, %v3950_v21 }
 0x17b   : > { %v1107_v38 = vpop.permute.xlu1 %1106 }
 0x17c   : > { %v869_v16 = vpop.permute.xlu0 %868  ;;  %v1301_v22 = vsel %vm1287_vm8, %v1280_v34, %v1107_v38 }
 0x17d   : > { %3138 = vmatmul.mubr.msk.f32.gmra.mrb[12].mxu0 %vm1313_vm9, %v1301_v22  ;;  %v1239_v55 = vsel %vm1224_vm5, %v1218_v54, %v869_v16 }
 0x17f   : > { %v633_v13 = vpop.permute.xlu1 %632 }
 0x180   : > { %v3958_v39 = vpop.permute.xlu0 %554  ;;  %v1178_v32 = vsel %vm1161_vm2, %v1157_v19, %v633_v13 }
 0x181   : > { %v1158_v25 = vsel %vm1140_vm1, %v3733_v47, %v3958_v39 }
 0x183   : > { %v949_v45 = vpop.permute.xlu1 %948 }
 0x184   : > { %v871_v46 = vpop.permute.xlu0 %870  ;;  %v1260_v29 = vsel %vm1245_vm6, %v1239_v55, %v949_v45 }
 0x185   : > { %v1240_v4 = vsel %vm1224_vm5, %v1219_v23, %v871_v46 }
 0x187   : > { %v713_v49 = vpop.permute.xlu1 %712 }
 0x188   : > { %v3960_v5 = vpop.permute.xlu0 %634  ;;  %v1199_v9 = vsel %vm1182_vm3, %v1178_v32, %v713_v49 }
 0x189   : > { %v1179_v40 = vsel %vm1161_vm2, %v1158_v25, %v3960_v5 }
 0x18b   : > { %v1029_v41 = vpop.permute.xlu1 %1028 }
 0x18c   : > { %v951_v37 = vpop.permute.xlu0 %950  ;;  %v1281_v61 = vsel %vm1266_vm7, %v1260_v29, %v1029_v41 }
 0x18d   : > { %v1261_v63 = vsel %vm1245_vm6, %v1240_v4, %v951_v37 }
 0x18f   : > { %v793_v50 = vpop.permute.xlu1 %792 }
 0x190   : > { %v3966_v53 = vpop.permute.xlu0 %714  ;;  %v3121_v60 = vpop.f32.mrb[0].mxu0  ;;  %v1220_v34 = vsel %vm1203_vm4, %v1199_v9, %v793_v50 }
 0x191   : > { %v1551_v17 = vmul.f32 %v3121_v60, %v3971_v52  ;;  %v1444_v58 = vpop.f32.mrb[1].mxu0  ;;  %v1200_v54 = vsel %vm1182_vm3, %v1179_v40, %v3966_v53 }
 0x192   : > { %v1550_v43 = vmul.f32 %v3971_v52, %v1444_v58 }
 0x193   : > { %v1109_v42 = vpop.permute.xlu1 %1108  ;;  %v1578_v2 = vadd.f32 %v3978_v48, %v1551_v17 }
 0x194   : > { %v1031_v0 = vpop.permute.xlu0 %1030  ;;  %v1302_v3 = vsel %vm1287_vm8, %v1281_v61, %v1109_v42  ;;  %v1577_v6 = vadd.f32 %v3978_v48, %v1550_v43 }
 0x195   : > { %3140 = vmatprep.mubr.msk.f32.mxu0 %vm1313_vm9, %v1302_v3  ;;  %v1598_v7 = vmax.f32 %v1578_v2, 0.0  ;;  %v1282_v56 = vsel %vm1266_vm7, %v1261_v63, %v1031_v0 }
 0x196   : > { %v1597_v10 = vmax.f32 %v1577_v6, 0.0 }
 0x197   : > { %v795_v59 = vpop.permute.xlu1 %794  ;;  %1618 = vst.msk [vmem:[#allocation2 + $0x9] sm:$0xff] %vm1140_vm1, %v1598_v7 }
 0x198   : > { %v557_v51 = vpop.permute.xlu0 %556  ;;  %1617 = vst.msk [vmem:[#allocation2 + $0x1] sm:$0xff] %vm1140_vm1, %v1597_v10  ;;  %v1221_v17 = vsel %vm1203_vm4, %v1200_v54, %v795_v59 }
 0x199   : > { %v1159_v0 = vsel %vm1140_vm1, %v3776_v1, %v557_v51 }
 0x19b   : > { %v1111_v11 = vpop.permute.xlu1 %1110 }
 0x19c   : > { %v873_v8 = vpop.permute.xlu0 %872  ;;  %v1303_v15 = vsel %vm1287_vm8, %v1282_v56, %v1111_v11 }
 0x19d   : > { %3141 = vmatmul.mubr.msk.f32.gmra.mrb[14].mxu0 %vm1313_vm9, %v1303_v15  ;;  %v1241_v38 = vsel %vm1224_vm5, %v1220_v34, %v873_v8 }
 0x19f   : > { %v637_v12 = vpop.permute.xlu1 %636 }
 0x1a0   : > { %v559_v18 = vpop.permute.xlu0 %558  ;;  %v1180_v3 = vsel %vm1161_vm2, %v1159_v0, %v637_v12 }
 0x1a1   : > { %v1160_v2 = vsel %vm1140_vm1, %v3801_v27, %v559_v18 }
 0x1a3   : > { %v953_v24 = vpop.permute.xlu1 %952 }
 0x1a4   : > { %v875_v26 = vpop.permute.xlu0 %874  ;;  %v1262_v22 = vsel %vm1245_vm6, %v1241_v38, %v953_v24 }
 0x1a5   : > { %v1242_v47 = vsel %vm1224_vm5, %v1221_v17, %v875_v26 }
 0x1a7   : > { %v717_v30 = vpop.permute.xlu1 %716 }
 0x1a8   : > { %v639_v36 = vpop.permute.xlu0 %638  ;;  %v1201_v6 = vsel %vm1182_vm3, %v1180_v3, %v717_v30 }
 0x1a9   : > { %v1181_v35 = vsel %vm1161_vm2, %v1160_v2, %v639_v36 }
 0x1ab   : > { %v1033_v62 = vpop.permute.xlu1 %1032 }
 0x1ac   : > { %v955_v14 = vpop.permute.xlu0 %954  ;;  %v1283_v41 = vsel %vm1266_vm7, %v1262_v22, %v1033_v62 }
 0x1ad   : > { %v1263_v39 = vsel %vm1245_vm6, %v1242_v47, %v955_v14 }
 0x1af   : > { %v797_v20 = vpop.permute.xlu1 %796 }
 0x1b0   : > { %v719_v33 = vpop.permute.xlu0 %718  ;;  %v3124_v16 = vpop.f32.mrb[2].mxu0  ;;  %v1222_v10 = vsel %vm1203_vm4, %v1201_v6, %v797_v20 }
 0x1b1   : > { %v1553_v45 = vmul.f32 %v3124_v16, %v3971_v52  ;;  %v1454_v46 = vpop.f32.mrb[3].mxu0  ;;  %v1202_v57 = vsel %vm1182_vm3, %v1181_v35, %v719_v33 }
 0x1b2   : > { %v1552_v28 = vmul.f32 %v3971_v52, %v1454_v46 }
 0x1b3   : > { %v1113_v21 = vpop.permute.xlu1 %1112  ;;  %v1580_v49 = vadd.f32 %v3978_v48, %v1553_v45 }
 0x1b4   : > { %v1035_v13 = vpop.permute.xlu0 %1034  ;;  %v1304_v37 = vsel %vm1287_vm8, %v1283_v41, %v1113_v21  ;;  %v1579_v44 = vadd.f32 %v3978_v48, %v1552_v28 }
 0x1b5   : > { %3143 = vmatprep.mubr.msk.f32.mxu0 %vm1313_vm9, %v1304_v37  ;;  %v1600_v50 = vmax.f32 %v1580_v49, 0.0  ;;  %v1284_v58 = vsel %vm1266_vm7, %v1263_v39, %v1035_v13  ;;  %v3300_v37 = vmov 0.0  }
 0x1b6   : > { %v1599_v55 = vmax.f32 %v1579_v44, 0.0  ;;  %1638 = vst.msk [vmem:[#allocation2] sm:$0x1] %vm1637_vm10, %v3300_v37  ;;  %1639 = vst.msk [vmem:[#allocation2 + $0x18] sm:$0x1] %vm1637_vm10, %v3300_v37 }
 0x1b7   : > { %v877_v60 = vpop.permute.xlu1 %876  ;;  %1620 = vst.msk [vmem:[#allocation2 + $0x21] sm:$0xff] %vm1140_vm1, %v1600_v50 }
 0x1b8   : > { %v799_v29 = vpop.permute.xlu0 %798  ;;  %1619 = vst.msk [vmem:[#allocation2 + $0x19] sm:$0xff] %vm1140_vm1, %v1599_v55  ;;  %v1243_v23 = vsel %vm1224_vm5, %v1222_v10, %v877_v60 }
 0x1b9   : > { %v1223_v59 = vsel %vm1203_vm4, %v1202_v57, %v799_v29  ;;  %1640 = vst.msk [vmem:[#allocation2 + $0x30] sm:$0x1] %vm1637_vm10, %v3300_v37  ;;  %1641 = vst.msk [vmem:[#allocation2 + $0x48] sm:$0x1] %vm1637_vm10, %v3300_v37 }
 0x1ba   : > { %1642 = vst.msk [vmem:[#allocation2 + $0x60] sm:$0x1] %vm1637_vm10, %v3300_v37  ;;  %1643 = vst.msk [vmem:[#allocation2 + $0x78] sm:$0x1] %vm1637_vm10, %v3300_v37 }
 0x1bb   : > { %v879_v5 = vpop.permute.xlu1 %878  ;;  %1644 = vst.msk [vmem:[#allocation2 + $0x90] sm:$0x1] %vm1637_vm10, %v3300_v37  ;;  %1645 = vst.msk [vmem:[#allocation2 + $0xa8] sm:$0x1] %vm1637_vm10, %v3300_v37 }
 0x1bc   : > { %v1115_v61 = vpop.permute.xlu0 %1114  ;;  %v1244_v1 = vsel %vm1224_vm5, %v1223_v59, %v879_v5  ;;  %1646 = vst.msk [vmem:[#allocation2 + $0xc0] sm:$0x1] %vm1637_vm10, %v3300_v37  ;;  %1647 = vst.msk [vmem:[#allocation2 + $0xd8] sm:$0x1] %vm1637_vm10, %v3300_v37 }
 0x1bd   : > { %v1305_v43 = vsel %vm1287_vm8, %v1284_v58, %v1115_v61  ;;  %1648 = vst.msk [vmem:[#allocation2 + $0x11] sm:$0x1] %vm1637_vm10, %v3300_v37  ;;  %1649 = vst.msk [vmem:[#allocation2 + $0x29] sm:$0x1] %vm1637_vm10, %v3300_v37 }
 0x1be   : > { %3144 = vmatmul.mubr.msk.f32.gmra.mrb[16].mxu0 %vm1313_vm9, %v1305_v43  ;;  %1650 = vst.msk [vmem:[#allocation2 + $0x41] sm:$0x1] %vm1637_vm10, %v3300_v37  ;;  %1651 = vst.msk [vmem:[#allocation2 + $0x59] sm:$0x1] %vm1637_vm10, %v3300_v37 }
 0x1bf   : > { %v959_v53 = vpop.permute.xlu1 %958  ;;  %1652 = vst.msk [vmem:[#allocation2 + $0x71] sm:$0x1] %vm1637_vm10, %v3300_v37  ;;  %1653 = vst.msk [vmem:[#allocation2 + $0x89] sm:$0x1] %vm1637_vm10, %v3300_v37 }
 0x1c0   : > { %v957_v42 = vpop.permute.xlu0 %956  ;;  %v1265_v27 = vsel %vm1245_vm6, %v1244_v1, %v959_v53  ;;  %1654 = vst.msk [vmem:[#allocation2 + $0xa1] sm:$0x1] %vm1637_vm10, %v3300_v37  ;;  %1655 = vst.msk [vmem:[#allocation2 + $0xb9] sm:$0x1] %vm1637_vm10, %v3300_v37 }
 0x1c1   : > { %v1264_v51 = vsel %vm1245_vm6, %v1243_v23, %v957_v42  ;;  %1656 = vst.msk [vmem:[#allocation2 + $0xd1] sm:$0x1] %vm1637_vm10, %v3300_v37  ;;  %1657 = vst.msk [vmem:[#allocation2 + $0xe9] sm:$0x1] %vm1637_vm10, %v3300_v37 }
 0x1c3   : > { %v1039_v7 = vpop.permute.xlu1 %1038 }
 0x1c4   : > { %v1037_v31 = vpop.permute.xlu0 %1036  ;;  %v1286_v4 = vsel %vm1266_vm7, %v1265_v27, %v1039_v7 }
 0x1c5   : > { %v1285_v63 = vsel %vm1266_vm7, %v1264_v51, %v1037_v31 }
 0x1c7   : > { %v1119_v56 = vpop.permute.xlu1 %1118 }
 0x1c8   : > { %v1117_v11 = vpop.permute.xlu0 %1116  ;;  %v1307_v8 = vsel %vm1287_vm8, %v1286_v4, %v1119_v56 }
 0x1c9   : > { %v1306_v15 = vsel %vm1287_vm8, %v1285_v63, %v1117_v11 }
 0x1ca   : > { %3146 = vmatprep.mubr.msk.f32.mxu0 %vm1313_vm9, %v1306_v15 }
 0x1cb   : > { %3147 = vmatmul.mubr.msk.f32.gmra.mrb[18].mxu0 %vm1313_vm9, %v1307_v8 }
 0x1d0   : > { %v3127_v12 = vpop.f32.mrb[4].mxu0 }
 0x1d1   : > { %v1555_v18 = vmul.f32 %v3127_v12, %v3971_v52  ;;  %v1464_v24 = vpop.f32.mrb[5].mxu0 }
 0x1d2   : > { %v1554_v26 = vmul.f32 %v3971_v52, %v1464_v24 }
 0x1d3   : > { %v1582_v30 = vadd.f32 %v3978_v48, %v1555_v18 }
 0x1d4   : > { %v1581_v36 = vadd.f32 %v3978_v48, %v1554_v26  ;;  %v3301_v26 = vmov (!%p3024_p8), 0.0  }
 0x1d5   : > { %v1602_v62 = vmax.f32 %v1582_v30, 0.0  ;;  %1662 = vst.msk [vmem:[#allocation2] sm:$0xff] (!%p3024_p8), %vm1140_vm1, %v3301_v26  ;;  %1663 = vst.msk [vmem:[#allocation2 + $0x8] sm:$0xff] (!%p3024_p8), %vm1140_vm1, %v3301_v26 }
 0x1d6   : > { %v1601_v14 = vmax.f32 %v1581_v36, 0.0  ;;  %1665 = vst.msk [vmem:[#allocation2 + $0x10] sm:$0x3] (!%p3024_p8), %vm1664_vm11, %v3301_v26 }
 0x1d7   : > { %1622 = vst.msk [vmem:[#allocation2 + $0x39] sm:$0xff] %vm1140_vm1, %v1602_v62 }
 0x1d8   : > { %1621 = vst.msk [vmem:[#allocation2 + $0x31] sm:$0xff] %vm1140_vm1, %v1601_v14 }
 0x1f0   : > { %v3130_v19 = vpop.f32.mrb[6].mxu0 }
 0x1f1   : > { %v1557_v32 = vmul.f32 %v3130_v19, %v3971_v52  ;;  %v1474_v9 = vpop.f32.mrb[7].mxu0 }
 0x1f2   : > { %v1556_v20 = vmul.f32 %v3971_v52, %v1474_v9 }
 0x1f3   : > { %v1584_v33 = vadd.f32 %v3978_v48, %v1557_v32 }
 0x1f4   : > { %v1583_v34 = vadd.f32 %v3978_v48, %v1556_v20 }
 0x1f5   : > { %v1604_v38 = vmax.f32 %v1584_v33, 0.0 }
 0x1f6   : > { %v1603_v16 = vmax.f32 %v1583_v34, 0.0 }
 0x1f7   : > { %1624 = vst.msk [vmem:[#allocation2 + $0x51] sm:$0xff] %vm1140_vm1, %v1604_v38 }
 0x1f8   : > { %1623 = vst.msk [vmem:[#allocation2 + $0x49] sm:$0xff] %vm1140_vm1, %v1603_v16 }
 0x210   : > { %v3133_v22 = vpop.f32.mrb[8].mxu0 }
 0x211   : > { %v1559_v45 = vmul.f32 %v3133_v22, %v3971_v52  ;;  %v1484_v46 = vpop.f32.mrb[9].mxu0 }
 0x212   : > { %v1558_v41 = vmul.f32 %v3971_v52, %v1484_v46 }
 0x213   : > { %v1586_v28 = vadd.f32 %v3978_v48, %v1559_v45 }
 0x214   : > { %v1585_v21 = vadd.f32 %v3978_v48, %v1558_v41 }
 0x215   : > { %v1606_v13 = vmax.f32 %v1586_v28, 0.0 }
 0x216   : > { %v1605_v49 = vmax.f32 %v1585_v21, 0.0 }
 0x217   : > { %1626 = vst.msk [vmem:[#allocation2 + $0x69] sm:$0xff] %vm1140_vm1, %v1606_v13 }
 0x218   : > { %1625 = vst.msk [vmem:[#allocation2 + $0x61] sm:$0xff] %vm1140_vm1, %v1605_v49 }
 0x230   : > { %v3136_v25 = vpop.f32.mrb[10].mxu0 }
 0x231   : > { %v1561_v44 = vmul.f32 %v3136_v25, %v3971_v52  ;;  %v1494_v40 = vpop.f32.mrb[11].mxu0 }
 0x232   : > { %v1560_v50 = vmul.f32 %v3971_v52, %v1494_v40 }
 0x233   : > { %v1588_v54 = vadd.f32 %v3978_v48, %v1561_v44 }
 0x234   : > { %v1587_v55 = vadd.f32 %v3978_v48, %v1560_v50 }
 0x235   : > { %v1608_v60 = vmax.f32 %v1588_v54, 0.0 }
 0x236   : > { %v1607_v29 = vmax.f32 %v1587_v55, 0.0 }
 0x237   : > { %1628 = vst.msk [vmem:[#allocation2 + $0x81] sm:$0xff] %vm1140_vm1, %v1608_v60 }
 0x238   : > { %1627 = vst.msk [vmem:[#allocation2 + $0x79] sm:$0xff] %vm1140_vm1, %v1607_v29 }
 0x250   : > { %v3139_v17 = vpop.f32.mrb[12].mxu0 }
 0x251   : > { %v1563_v47 = vmul.f32 %v3139_v17, %v3971_v52  ;;  %v1504_v39 = vpop.f32.mrb[13].mxu0 }
 0x252   : > { %v1562_v58 = vmul.f32 %v3971_v52, %v1504_v39 }
 0x253   : > { %v1590_v5 = vadd.f32 %v3978_v48, %v1563_v47 }
 0x254   : > { %v1589_v61 = vadd.f32 %v3978_v48, %v1562_v58 }
 0x255   : > { %v1610_v43 = vmax.f32 %v1590_v5, 0.0 }
 0x256   : > { %v1609_v53 = vmax.f32 %v1589_v61, 0.0 }
 0x257   : > { %1630 = vst.msk [vmem:[#allocation2 + $0x99] sm:$0xff] %vm1140_vm1, %v1610_v43 }
 0x258   : > { %1629 = vst.msk [vmem:[#allocation2 + $0x91] sm:$0xff] %vm1140_vm1, %v1609_v53 }
 0x270   : > { %v3142_v42 = vpop.f32.mrb[14].mxu0 }
 0x271   : > { %v1565_v0 = vmul.f32 %v3142_v42, %v3971_v52  ;;  %v1514_v2 = vpop.f32.mrb[15].mxu0 }
 0x272   : > { %v1564_v3 = vmul.f32 %v3971_v52, %v1514_v2 }
 0x273   : > { %v1592_v35 = vadd.f32 %v3978_v48, %v1565_v0 }
 0x274   : > { %v1591_v6 = vadd.f32 %v3978_v48, %v1564_v3 }
 0x275   : > { %v1612_v57 = vmax.f32 %v1592_v35, 0.0 }
 0x276   : > { %v1611_v7 = vmax.f32 %v1591_v6, 0.0 }
 0x277   : > { %1632 = vst.msk [vmem:[#allocation2 + $0xb1] sm:$0xff] %vm1140_vm1, %v1612_v57 }
 0x278   : > { %1631 = vst.msk [vmem:[#allocation2 + $0xa9] sm:$0xff] %vm1140_vm1, %v1611_v7 }
 0x291   : > { %v3145_v31 = vpop.f32.mrb[16].mxu0 }
 0x292   : > { %v1567_v10 = vmul.f32 %v3145_v31, %v3971_v52  ;;  %v1524_v59 = vpop.f32.mrb[17].mxu0 }
 0x293   : > { %v1566_v23 = vmul.f32 %v3971_v52, %v1524_v59 }
 0x294   : > { %v1594_v1 = vadd.f32 %v3978_v48, %v1567_v10 }
 0x295   : > { %v1593_v27 = vadd.f32 %v3978_v48, %v1566_v23 }
 0x296   : > { %v1614_v51 = vmax.f32 %v1594_v1, 0.0 }
 0x297   : > { %v1613_v4 = vmax.f32 %v1593_v27, 0.0 }
 0x298   : > { %1634 = vst.msk [vmem:[#allocation2 + $0xc9] sm:$0xff] %vm1140_vm1, %v1614_v51 }
 0x299   : > { %1633 = vst.msk [vmem:[#allocation2 + $0xc1] sm:$0xff] %vm1140_vm1, %v1613_v4 }
 0x29e   : > { %v3148_v63 = vpop.f32.mrb[18].mxu0 }
 0x29f   : > { %v1569_v56 = vmul.f32 %v3148_v63, %v3971_v52  ;;  %v1534_v11 = vpop.f32.mrb[19].mxu0 }
 0x2a0   : > { %v1568_v8 = vmul.f32 %v3971_v52, %v1534_v11  ;;  %1661 = sbr.rel (%p3024_p8) target bundleno = 679 (0x2a7), region = 52 }
 0x2a1   : > { %v1596_v15 = vadd.f32 %v3978_v48, %v1569_v56 }
 0x2a2   : > { %v1595_v12 = vadd.f32 %v3978_v48, %v1568_v8 }
 0x2a3   : > { %v1616_v18 = vmax.f32 %v1596_v15, 0.0 }
 0x2a4   : > { %v1615_v24 = vmax.f32 %v1595_v12, 0.0 }
 0x2a5   : > { %1636 = vst.msk [vmem:[#allocation2 + $0xe1] sm:$0xff] %vm1140_vm1, %v1616_v18 }
 0x2a6   : > { %1635 = vst.msk [vmem:[#allocation2 + $0xd9] sm:$0xff] %vm1140_vm1, %v1615_v24 }
 0x2a7 PF: > { %p3025_p9 = scmp.ne.s32.totalorder %s3274_s24, 1 }
 0x2a8   : > { %vm1673_vm12 = vcmask (!%p3025_p9), 25600   ;;  %v3302_v52 = vmov (!%p3025_p9), 0.0  }
 0x2a9   : > { %1669 = sbr.rel (%p3025_p9) target bundleno = 688 (0x2b0), region = 56  ;;  %1671 = vst.msk [vmem:[#allocation2 + $0xd8] sm:$0xff] (!%p3025_p9), %vm1140_vm1, %v3302_v52  ;;  %1672 = vst.msk [vmem:[#allocation2 + $0xe0] sm:$0xff] (!%p3025_p9), %vm1140_vm1, %v3302_v52 }
 0x2aa   : > { %1674 = vst.msk [vmem:[#allocation2 + $0xe8] sm:$0x3] (!%p3025_p9), %vm1673_vm12, %v3302_v52 }
 0x2b0 PF: > { %v1707_v48 = vld [vmem:[#allocation2 + $0x2] sm:$0xff]  ;;  %v1708_v36 = vld [vmem:[#allocation2 + $0xa] sm:$0xff]  ;;  %v4130_v19 = vld [vmem:[#allocation2 + $0x18] sm:$0xff] }
 0x2b1   : > { %v1691_v30 = vld [vmem:[#allocation2 + $0x1] sm:$0xff]  ;;  %1901 = vrot.lane.b32.xlu1 %v1707_v48, %s3292_s25  ;;  %v1692_v62 = vld [vmem:[#allocation2 + $0x9] sm:$0xff]  ;;  %v1693_v32 = vld [vmem:[#allocation2 + $0x19] sm:$0xff] }
 0x2b2   : > { %1837 = vrot.lane.b32.xlu0 %v1691_v30, %s3293_s8  ;;  %v4128_v14 = vld [vmem:[#allocation2 + $0x20] sm:$0xff]  ;;  %v4142_v33 = vld [vmem:[#allocation2 + $0x30] sm:$0xff]  ;;  %v2462_v16 = vld [vmem:[%s4656_s4 + $0x8] sm:$0xff] }
 0x2b3   : > { %v1756_v9 = vld [vmem:[#allocation2 + $0x1a] sm:$0xff]  ;;  %v1757_v34 = vld [vmem:[#allocation2 + $0x22] sm:$0xff]  ;;  %v2463_v45 = vld [vmem:[%s4656_s4 + $0x10] sm:$0xff] }
 0x2b4   : > { %v1741_v20 = vld [vmem:[#allocation2 + $0x21] sm:$0xff]  ;;  %v2464_v46 = vld [vmem:[%s4656_s4 + $0x18] sm:$0xff]  ;;  %v1791_v40 = vld [vmem:[#allocation2 + $0x49] sm:$0xff] }
 0x2b5   : > { %1903 = vrot.lane.b32.xlu1 %v1708_v36, %s3292_s25  ;;  %v2461_v38 = vld [vmem:[%s4656_s4] sm:$0xff]  ;;  %v1789_v41 = vld [vmem:[#allocation2 + $0x31] sm:$0xff]  ;;  %v3195_v21 = vpack.c.bf16 %v2464_v46, %v2463_v45  ;;  %v4183_v44 = vld [vmem:[#allocation2 + $0x48] sm:$0xff] }
 0x2b6   : > { %1839 = vrot.lane.b32.xlu0 %v1692_v62, %s3293_s8  ;;  %v3191_v22 = vpack.c.bf16 %v2462_v16, %v2461_v38  ;;  %v4162_v28 = vld [vmem:[#allocation2 + $0x38] sm:$0xff]  ;;  %v2465_v13 = vld [vmem:[%s4656_s4 + $0x20] sm:$0xf]  ;;  %v4191_v50 = vld [vmem:[#allocation2 + $0x50] sm:$0xff] }
 0x2b7   : > { %v1805_v49 = vld [vmem:[#allocation2 + $0x32] sm:$0xff]  ;;  %v1806_v25 = vld [vmem:[#allocation2 + $0x3a] sm:$0xff]  ;;  %v1807_v54 = vld [vmem:[#allocation2 + $0x4a] sm:$0xff] }
 0x2b8   : > { %3192 = vmatprep.subr.bf16.mxu1 %v3191_v22  ;;  %v1790_v37 = vld [vmem:[#allocation2 + $0x39] sm:$0xff]  ;;  %v1792_v55 = vld [vmem:[#allocation2 + $0x51] sm:$0xff]  ;;  %v1793_v17 = vld [vmem:[#allocation2 + $0x61] sm:$0xff] }
 0x2b9   : > { %1967 = vrot.lane.b32.xlu1 %v4128_v14, %s3294_s9  ;;  %3194 = vmatpush3.bf16.msra.mxu1 %v3191_v22  ;;  %v1808_v60 = vld [vmem:[#allocation2 + $0x52] sm:$0xff]  ;;  %v4207_v29 = vld [vmem:[#allocation2 + $0x60] sm:$0xff]  ;;  %v4215_v47 = vld [vmem:[#allocation2 + $0x68] sm:$0xff] }
 0x2ba   : > { %1965 = vrot.lane.b32.xlu0 %v4130_v19, %s3294_s9  ;;  %3196 = vmatprep.subr.bf16.mxu1 %v3195_v21  ;;  %v1809_v39 = vld [vmem:[#allocation2 + $0x62] sm:$0xff]  ;;  %v1810_v5 = vld [vmem:[#allocation2 + $0x6a] sm:$0xff]  ;;  %v4231_v53 = vld [vmem:[#allocation2 + $0x78] sm:$0xff] }
 0x2bb   : > { %v1794_v58 = vld [vmem:[#allocation2 + $0x69] sm:$0xff]  ;;  %v1795_v35 = vld [vmem:[#allocation2 + $0x79] sm:$0xff]  ;;  %v1796_v23 = vld [vmem:[#allocation2 + $0x81] sm:$0xff] }
 0x2bc   : > { %v4239_v6 = vld [vmem:[#allocation2 + $0x80] sm:$0xff]  ;;  %v4267_v26 = vld [vmem:[#allocation2 + $0x90] sm:$0xff]  ;;  %v1676_v36 = vld [vmem:[#allocation2 + $0x8] sm:$0xff] }
 0x2bd   : > { %1841 = vrot.lane.b32.xlu1 %v1693_v32, %s3293_s8  ;;  %3198 = vmatpush3.bf16.msra.mxu1 %v3195_v21  ;;  %v1811_v59 = vld [vmem:[#allocation2 + $0x7a] sm:$0xff]  ;;  %v1812_v63 = vld [vmem:[#allocation2 + $0x82] sm:$0xff]  ;;  %v1797_v46 = vld [vmem:[#allocation2 + $0x91] sm:$0xff] }
 0x2be   : > { %2029 = vrot.lane.b32.xlu0 %v1693_v32, %s3295_s10  ;;  %3157 = vmatprep.subr.msk.mxu1 %vm1374_vm0, %v2465_v13  ;;  %v1675_v8 = vld [vmem:[#allocation2] sm:$0xff] }
 0x2c1   : > { %2093 = vrot.lane.b32.xlu1 %v1756_v9, %s3296_s11  ;;  %3158 = vmatpush3.msk.msra.mxu1 %vm1374_vm0, %v2465_v13 }
 0x2c2   : > { %2031 = vrot.lane.b32.xlu0 %v1741_v20, %s3295_s10 }
 0x2c5   : > { %1905 = vrot.lane.b32.xlu1 %v1756_v9, %s3292_s25 }
 0x2c6   : > { %1843 = vrot.lane.b32.xlu0 %v1741_v20, %s3293_s8 }
 0x2c9   : > { %2157 = vrot.lane.b32.xlu1 %v4142_v33, %s3297_s16 }
 0x2ca   : > { %2095 = vrot.lane.b32.xlu0 %v1757_v34, %s3296_s11 }
 0x2cd   : > { %1969 = vrot.lane.b32.xlu1 %v4142_v33, %s3294_s9 }
 0x2ce   : > { %1907 = vrot.lane.b32.xlu0 %v1757_v34, %s3292_s25 }
 0x2d1   : > { %2221 = vrot.lane.b32.xlu1 %v1789_v41, %s3298_s22 }
 0x2d2   : > { %2159 = vrot.lane.b32.xlu0 %v4162_v28, %s3297_s16 }
 0x2d5   : > { %2033 = vrot.lane.b32.xlu1 %v1789_v41, %s3295_s10 }
 0x2d6   : > { %1971 = vrot.lane.b32.xlu0 %v4162_v28, %s3294_s9 }
 0x2d9   : > { %2285 = vrot.lane.b32.xlu1 %v1805_v49, %s3299_s14 }
 0x2da   : > { %2223 = vrot.lane.b32.xlu0 %v1790_v37, %s3298_s22 }
 0x2dd   : > { %2035 = vrot.lane.b32.xlu1 %v1790_v37, %s3295_s10 }
 0x2de   : > { %1845 = vrot.lane.b32.xlu0 %v1789_v41, %s3293_s8  ;;  %v4286_v41 = vld [vmem:[#allocation2 + $0x98] sm:$0xff] }
 0x2e1   : > { %2287 = vrot.lane.b32.xlu1 %v1806_v25, %s3299_s14 }
 0x2e2   : > { %2097 = vrot.lane.b32.xlu0 %v1805_v49, %s3296_s11 }
 0x2e5   : > { %1909 = vrot.lane.b32.xlu1 %v1805_v49, %s3292_s25 }
 0x2e6   : > { %1847 = vrot.lane.b32.xlu0 %v1790_v37, %s3293_s8 }
 0x2e9   : > { %2161 = vrot.lane.b32.xlu1 %v4183_v44, %s3297_s16 }
 0x2ea   : > { %2099 = vrot.lane.b32.xlu0 %v1806_v25, %s3296_s11 }
 0x2ed   : > { %1973 = vrot.lane.b32.xlu1 %v4183_v44, %s3294_s9 }
 0x2ee   : > { %1911 = vrot.lane.b32.xlu0 %v1806_v25, %s3292_s25 }
 0x2f1   : > { %2225 = vrot.lane.b32.xlu1 %v1791_v40, %s3298_s22 }
 0x2f2   : > { %2163 = vrot.lane.b32.xlu0 %v4191_v50, %s3297_s16 }
 0x2f5   : > { %2037 = vrot.lane.b32.xlu1 %v1791_v40, %s3295_s10 }
 0x2f6   : > { %1975 = vrot.lane.b32.xlu0 %v4191_v50, %s3294_s9 }
 0x2f9   : > { %2289 = vrot.lane.b32.xlu1 %v1807_v54, %s3299_s14 }
 0x2fa   : > { %2227 = vrot.lane.b32.xlu0 %v1792_v55, %s3298_s22 }
 0x2fd   : > { %2039 = vrot.lane.b32.xlu1 %v1792_v55, %s3295_s10 }
 0x2fe   : > { %1849 = vrot.lane.b32.xlu0 %v1791_v40, %s3293_s8 }
 0x301   : > { %2291 = vrot.lane.b32.xlu1 %v1808_v60, %s3299_s14 }
 0x302   : > { %2101 = vrot.lane.b32.xlu0 %v1807_v54, %s3296_s11 }
 0x305   : > { %1913 = vrot.lane.b32.xlu1 %v1807_v54, %s3292_s25 }
 0x306   : > { %1851 = vrot.lane.b32.xlu0 %v1792_v55, %s3293_s8 }
 0x309   : > { %2165 = vrot.lane.b32.xlu1 %v4207_v29, %s3297_s16 }
 0x30a   : > { %2103 = vrot.lane.b32.xlu0 %v1808_v60, %s3296_s11 }
 0x30d   : > { %1977 = vrot.lane.b32.xlu1 %v4207_v29, %s3294_s9 }
 0x30e   : > { %1915 = vrot.lane.b32.xlu0 %v1808_v60, %s3292_s25 }
 0x311   : > { %2229 = vrot.lane.b32.xlu1 %v1793_v17, %s3298_s22 }
 0x312   : > { %2167 = vrot.lane.b32.xlu0 %v4215_v47, %s3297_s16 }
 0x315   : > { %2041 = vrot.lane.b32.xlu1 %v1793_v17, %s3295_s10 }
 0x316   : > { %1979 = vrot.lane.b32.xlu0 %v4215_v47, %s3294_s9 }
 0x319   : > { %2293 = vrot.lane.b32.xlu1 %v1809_v39, %s3299_s14 }
 0x31a   : > { %2231 = vrot.lane.b32.xlu0 %v1794_v58, %s3298_s22 }
 0x31d   : > { %2043 = vrot.lane.b32.xlu1 %v1794_v58, %s3295_s10 }
 0x31e   : > { %1853 = vrot.lane.b32.xlu0 %v1793_v17, %s3293_s8 }
 0x321   : > { %2295 = vrot.lane.b32.xlu1 %v1810_v5, %s3299_s14 }
 0x322   : > { %2105 = vrot.lane.b32.xlu0 %v1809_v39, %s3296_s11 }
 0x323   : > { %v1902_v61 = vpop.permute.xlu1 %1901 }
 0x324   : > { %v1838_v43 = vpop.permute.xlu0 %1837 }
 0x325   : > { %1917 = vrot.lane.b32.xlu1 %v1809_v39, %s3292_s25  ;;  %v2333_v15 = vsel %vm1140_vm1, %v1675_v8, %v1838_v43  ;;  %v1813_v39 = vld [vmem:[#allocation2 + $0x92] sm:$0xff] }
 0x326   : > { %1855 = vrot.lane.b32.xlu0 %v1794_v58, %s3293_s8  ;;  %v2349_v24 = vsel %vm1161_vm2, %v2333_v15, %v1902_v61  ;;  %v1798_v58 = vld [vmem:[#allocation2 + $0x99] sm:$0xff] }
 0x327   : > { %v1904_v42 = vpop.permute.xlu1 %1903 }
 0x328   : > { %v1840_v0 = vpop.permute.xlu0 %1839 }
 0x329   : > { %2169 = vrot.lane.b32.xlu1 %v4231_v53, %s3297_s16  ;;  %v2334_v20 = vsel %vm1140_vm1, %v1676_v36, %v1840_v0  ;;  %v1814_v0 = vld [vmem:[#allocation2 + $0x9a] sm:$0xff] }
 0x32a   : > { %2107 = vrot.lane.b32.xlu0 %v1810_v5, %s3296_s11  ;;  %v2350_v45 = vsel %vm1161_vm2, %v2334_v20, %v1904_v42 }
 0x32b   : > { %v1968_v2 = vpop.permute.xlu1 %1967 }
 0x32c   : > { %v1966_v3 = vpop.permute.xlu0 %1965  ;;  %v2366_v21 = vsel %vm1182_vm3, %v2350_v45, %v1968_v2 }
 0x32d   : > { %1981 = vrot.lane.b32.xlu1 %v4231_v53, %s3294_s9  ;;  %v2365_v52 = vsel %vm1182_vm3, %v2349_v24, %v1966_v3  ;;  %v1799_v24 = vld [vmem:[#allocation2 + $0xa9] sm:$0xff] }
 0x32e   : > { %1919 = vrot.lane.b32.xlu0 %v1810_v5, %s3292_s25 }
 0x32f   : > { %v4241_v57 = vpop.permute.xlu1 %1841 }
 0x330   : > { %v2030_v7 = vpop.permute.xlu0 %2029 }
 0x331   : > { %2233 = vrot.lane.b32.xlu1 %v1795_v35, %s3298_s22  ;;  %v2381_v62 = vsel %vm1203_vm4, %v2365_v52, %v2030_v7  ;;  %v4347_v52 = vld [vmem:[#allocation2 + $0xb0] sm:$0xff] }
 0x332   : > { %2171 = vrot.lane.b32.xlu0 %v4239_v6, %s3297_s16 }
 0x333   : > { %v2094_v31 = vpop.permute.xlu1 %2093 }
 0x334   : > { %v2032_v10 = vpop.permute.xlu0 %2031  ;;  %v2397_v32 = vsel %vm1224_vm5, %v2381_v62, %v2094_v31  ;;  %v2335_v31 = vsel %vm1140_vm1, %v4130_v19, %v4241_v57 }
 0x335   : > { %2045 = vrot.lane.b32.xlu1 %v1795_v35, %s3295_s10  ;;  %v2382_v37 = vsel %vm1203_vm4, %v2366_v21, %v2032_v10  ;;  %v1816_v21 = vld [vmem:[#allocation2 + $0xb2] sm:$0xff] }
 0x336   : > { %1983 = vrot.lane.b32.xlu0 %v4239_v6, %s3294_s9 }
 0x337   : > { %v4249_v1 = vpop.permute.xlu1 %1905 }
 0x338   : > { %v4251_v27 = vpop.permute.xlu0 %1843  ;;  %v2351_v10 = vsel %vm1161_vm2, %v2335_v31, %v4249_v1  ;;  %v1801_v31 = vld [vmem:[#allocation2 + $0xc1] sm:$0xff] }
 0x339   : > { %2297 = vrot.lane.b32.xlu1 %v1811_v59, %s3299_s14 }
 0x33a   : > { %2235 = vrot.lane.b32.xlu0 %v1796_v23, %s3298_s22 }
 0x33b   : > { %v2158_v51 = vpop.permute.xlu1 %2157 }
 0x33c   : > { %v2096_v4 = vpop.permute.xlu0 %2095  ;;  %v2413_v9 = vsel %vm1245_vm6, %v2397_v32, %v2158_v51 }
 0x33d   : > { %2047 = vrot.lane.b32.xlu1 %v1796_v23, %s3295_s10  ;;  %v2398_v25 = vsel %vm1224_vm5, %v2382_v37, %v2096_v4 }
 0x33e   : > { %1857 = vrot.lane.b32.xlu0 %v1795_v35, %s3293_s8 }
 0x33f   : > { %v4257_v56 = vpop.permute.xlu1 %1969 }
 0x340   : > { %v4259_v11 = vpop.permute.xlu0 %1907 }
 0x341   : > { %2299 = vrot.lane.b32.xlu1 %v1812_v63, %s3299_s14 }
 0x342   : > { %2109 = vrot.lane.b32.xlu0 %v1811_v59, %s3296_s11 }
 0x343   : > { %v2222_v12 = vpop.permute.xlu1 %2221 }
 0x344   : > { %v2160_v18 = vpop.permute.xlu0 %2159  ;;  %v2429_v16 = vsel %vm1266_vm7, %v2413_v9, %v2222_v12  ;;  %v2336_v12 = vsel %vm1140_vm1, %v4128_v14, %v4251_v27 }
 0x345   : > { %1921 = vrot.lane.b32.xlu1 %v1811_v59, %s3292_s25  ;;  %v2414_v40 = vsel %vm1245_vm6, %v2398_v25, %v2160_v18  ;;  %v4324_v59 = vld [vmem:[#allocation2 + $0xa8] sm:$0xff]  ;;  %v2352_v18 = vsel %vm1161_vm2, %v2336_v12, %v4259_v11 }
 0x346   : > { %1859 = vrot.lane.b32.xlu0 %v1796_v23, %s3293_s8  ;;  %v2367_v23 = vsel %vm1182_vm3, %v2351_v10, %v4257_v56  ;;  %v1786_v10 = vld [vmem:[#allocation2 + $0xc8] sm:$0xff] }
 0x347   : > { %v2034_v48 = vpop.permute.xlu1 %2033 }
 0x348   : > { %v4270_v30 = vpop.permute.xlu0 %1971 }
 0x349   : > { %2173 = vrot.lane.b32.xlu1 %v4267_v26, %s3297_s16 }
 0x34a   : > { %2111 = vrot.lane.b32.xlu0 %v1812_v63, %s3296_s11 }
 0x34b   : > { %v2286_v34 = vpop.permute.xlu1 %2285 }
 0x34c   : > { %v2224_v38 = vpop.permute.xlu0 %2223  ;;  %v2445_v22 = vsel %vm1287_vm8, %v2429_v16, %v2286_v34  ;;  %v1815_v34 = vld [vmem:[#allocation2 + $0xaa] sm:$0xff] }
 0x34d   : > { %1985 = vrot.lane.b32.xlu1 %v4267_v26, %s3294_s9  ;;  %3159 = vmatprep.mubr.msk.f32.mxu1 %vm1313_vm9, %v2445_v22  ;;  %v2430_v54 = vsel %vm1266_vm7, %v2414_v40, %v2224_v38  ;;  %v1800_v38 = vld [vmem:[#allocation2 + $0xb1] sm:$0xff] }
 0x34e   : > { %1923 = vrot.lane.b32.xlu0 %v1812_v63, %s3292_s25  ;;  %v2383_v63 = vsel %vm1203_vm4, %v2367_v23, %v2034_v48  ;;  %v2368_v48 = vsel %vm1182_vm3, %v2352_v18, %v4270_v30 }
 0x34f   : > { %v2036_v13 = vpop.permute.xlu1 %2035 }
 0x350   : > { %v4289_v49 = vpop.permute.xlu0 %1845  ;;  %v2384_v14 = vsel %vm1203_vm4, %v2368_v48, %v2036_v13  ;;  %v1771_v48 = vld [vmem:[#allocation2 + $0xca] sm:$0xff] }
 0x351   : > { %2237 = vrot.lane.b32.xlu1 %v1797_v46, %s3298_s22 }
 0x352   : > { %2175 = vrot.lane.b32.xlu0 %v4286_v41, %s3297_s16 }
 0x353   : > { %v2288_v55 = vpop.permute.xlu1 %2287 }
 0x354   : > { %v2098_v60 = vpop.permute.xlu0 %2097  ;;  %v2446_v17 = vsel %vm1287_vm8, %v2430_v54, %v2288_v55  ;;  %v2337_v54 = vsel %vm1140_vm1, %v4142_v33, %v4289_v49 }
 0x355   : > { %2049 = vrot.lane.b32.xlu1 %v1797_v46, %s3295_s10  ;;  %3160 = vmatmul.mubr.msk.f32.vlgmr.msra.gmra.mrb[0].mxu1 %vm1313_vm9, %v2446_v17  ;;  %v2399_v8 = vsel %vm1224_vm5, %v2383_v63, %v2098_v60  ;;  %v1785_v60 = vld [vmem:[#allocation2 + $0xc0] sm:$0xff] }
 0x356   : > { %1987 = vrot.lane.b32.xlu0 %v4286_v41, %s3294_s9 }
 0x357   : > { %v4303_v5 = vpop.permute.xlu1 %1909 }
 0x358   : > { %v4305_v61 = vpop.permute.xlu0 %1847  ;;  %v2353_v55 = vsel %vm1161_vm2, %v2337_v54, %v4303_v5  ;;  %v1819_v54 = vld [vmem:[#allocation2 + $0xda] sm:$0xff] }
 0x359   : > { %2301 = vrot.lane.b32.xlu1 %v1813_v39, %s3299_s14 }
 0x35a   : > { %2239 = vrot.lane.b32.xlu0 %v1798_v58, %s3298_s22 }
 0x35b   : > { %v2162_v43 = vpop.permute.xlu1 %2161 }
 0x35c   : > { %v2100_v42 = vpop.permute.xlu0 %2099  ;;  %v2415_v19 = vsel %vm1245_vm6, %v2399_v8, %v2162_v43 }
 0x35d   : > { %2051 = vrot.lane.b32.xlu1 %v1798_v58, %s3295_s10  ;;  %v2400_v27 = vsel %vm1224_vm5, %v2384_v14, %v2100_v42 }
 0x35e   : > { %1861 = vrot.lane.b32.xlu0 %v1797_v46, %s3293_s8 }
 0x35f   : > { %v4311_v2 = vpop.permute.xlu1 %1973 }
 0x360   : > { %v4313_v3 = vpop.permute.xlu0 %1911  ;;  %v2369_v17 = vsel %vm1182_vm3, %v2353_v55, %v4311_v2  ;;  %v2338_v2 = vsel %vm1140_vm1, %v4162_v28, %v4305_v61 }
 0x361   : > { %2303 = vrot.lane.b32.xlu1 %v1814_v0, %s3299_s14 }
 0x362   : > { %2113 = vrot.lane.b32.xlu0 %v1813_v39, %s3296_s11 }
 0x363   : > { %v2226_v35 = vpop.permute.xlu1 %2225 }
 0x364   : > { %v2164_v7 = vpop.permute.xlu0 %2163  ;;  %v2431_v57 = vsel %vm1266_vm7, %v2415_v19, %v2226_v35 }
 0x365   : > { %1925 = vrot.lane.b32.xlu1 %v1813_v39, %s3292_s25  ;;  %v2416_v11 = vsel %vm1245_vm6, %v2400_v27, %v2164_v7  ;;  %v2354_v7 = vsel %vm1161_vm2, %v2338_v2, %v4313_v3  ;;  %v1788_v27 = vld [vmem:[#allocation2 + $0xe0] sm:$0xff] }
 0x366   : > { %1863 = vrot.lane.b32.xlu0 %v1798_v58, %s3293_s8 }
 0x367   : > { %v2038_v51 = vpop.permute.xlu1 %2037 }
 0x368   : > { %v4328_v4 = vpop.permute.xlu0 %1975  ;;  %v2385_v43 = vsel %vm1203_vm4, %v2369_v17, %v2038_v51 }
 0x369   : > { %2177 = vrot.lane.b32.xlu1 %v4324_v59, %s3297_s16  ;;  %v2370_v23 = vsel %vm1182_vm3, %v2354_v7, %v4328_v4  ;;  %v1817_v4 = vld [vmem:[#allocation2 + $0xc2] sm:$0xff] }
 0x36a   : > { %2115 = vrot.lane.b32.xlu0 %v1814_v0, %s3296_s11 }
 0x36b   : > { %v2290_v1 = vpop.permute.xlu1 %2289 }
 0x36c   : > { %v2228_v15 = vpop.permute.xlu0 %2227  ;;  %v2447_v56 = vsel %vm1287_vm8, %v2431_v57, %v2290_v1 }
 0x36d   : > { %1989 = vrot.lane.b32.xlu1 %v4324_v59, %s3294_s9  ;;  %3162 = vmatprep.mubr.msk.f32.mxu1 %vm1313_vm9, %v2447_v56  ;;  %v2432_v32 = vsel %vm1266_vm7, %v2416_v11, %v2228_v15  ;;  %v1802_v15 = vld [vmem:[#allocation2 + $0xc9] sm:$0xff]  ;;  %v1787_v11 = vld [vmem:[#allocation2 + $0xd8] sm:$0xff] }
 0x36e   : > { %1927 = vrot.lane.b32.xlu0 %v1814_v0, %s3292_s25 }
 0x36f   : > { %v2040_v36 = vpop.permute.xlu1 %2039 }
 0x370   : > { %v4351_v62 = vpop.permute.xlu0 %1849  ;;  %v2386_v8 = vsel %vm1203_vm4, %v2370_v23, %v2040_v36 }
 0x371   : > { %2241 = vrot.lane.b32.xlu1 %v1799_v24, %s3298_s22 }
 0x372   : > { %2179 = vrot.lane.b32.xlu0 %v4347_v52, %s3297_s16 }
 0x373   : > { %v2292_v9 = vpop.permute.xlu1 %2291 }
 0x374   : > { %v2102_v20 = vpop.permute.xlu0 %2101  ;;  %v2448_v30 = vsel %vm1287_vm8, %v2432_v32, %v2292_v9 }
 0x375   : > { %2053 = vrot.lane.b32.xlu1 %v1799_v24, %s3295_s10  ;;  %3163 = vmatmul.mubr.msk.f32.gmra.mrb[2].mxu1 %vm1313_vm9, %v2448_v30  ;;  %v2401_v42 = vsel %vm1224_vm5, %v2385_v43, %v2102_v20  ;;  %v2339_v20 = vsel %vm1140_vm1, %v4183_v44, %v4351_v62  ;;  %v1820_v62 = vld [vmem:[#allocation2 + $0xe2] sm:$0xff] }
 0x376   : > { %1991 = vrot.lane.b32.xlu0 %v4347_v52, %s3294_s9 }
 0x377   : > { %v4365_v16 = vpop.permute.xlu1 %1913 }
 0x378   : > { %v4367_v22 = vpop.permute.xlu0 %1851  ;;  %v2355_v30 = vsel %vm1161_vm2, %v2339_v20, %v4365_v16 }
 0x379   : > { %2305 = vrot.lane.b32.xlu1 %v1815_v34, %s3299_s14  ;;  %v2340_v17 = vsel %vm1140_vm1, %v4191_v50, %v4367_v22 }
 0x37a   : > { %2243 = vrot.lane.b32.xlu0 %v1800_v38, %s3298_s22 }
 0x37b   : > { %v2166_v45 = vpop.permute.xlu1 %2165 }
 0x37c   : > { %v2104_v46 = vpop.permute.xlu0 %2103  ;;  %v2417_v33 = vsel %vm1245_vm6, %v2401_v42, %v2166_v45 }
 0x37d   : > { %2055 = vrot.lane.b32.xlu1 %v1800_v38, %s3295_s10  ;;  %v2402_v28 = vsel %vm1224_vm5, %v2386_v8, %v2104_v46 }
 0x37e   : > { %1865 = vrot.lane.b32.xlu0 %v1799_v24, %s3293_s8 }
 0x37f   : > { %v4373_v13 = vpop.permute.xlu1 %1977 }
 0x380   : > { %v4375_v37 = vpop.permute.xlu0 %1915  ;;  %v2371_v45 = vsel %vm1182_vm3, %v2355_v30, %v4373_v13 }
 0x381   : > { %2307 = vrot.lane.b32.xlu1 %v1816_v21, %s3299_s14 }
 0x382   : > { %2117 = vrot.lane.b32.xlu0 %v1815_v34, %s3296_s11 }
 0x383   : > { %v2230_v25 = vpop.permute.xlu1 %2229 }
 0x384   : > { %v2168_v40 = vpop.permute.xlu0 %2167  ;;  %v2433_v49 = vsel %vm1266_vm7, %v2417_v33, %v2230_v25 }
 0x385   : > { %1929 = vrot.lane.b32.xlu1 %v1815_v34, %s3292_s25  ;;  %v2418_v61 = vsel %vm1245_vm6, %v2402_v28, %v2168_v40  ;;  %v1804_v34 = vld [vmem:[#allocation2 + $0xe1] sm:$0xff] }
 0x386   : > { %1867 = vrot.lane.b32.xlu0 %v1800_v38, %s3293_s8  ;;  %v1803_v38 = vld [vmem:[#allocation2 + $0xd9] sm:$0xff] }
 0x387   : > { %v2042_v39 = vpop.permute.xlu1 %2041 }
 0x388   : > { %v4388_v58 = vpop.permute.xlu0 %1979  ;;  %v2387_v25 = vsel %vm1203_vm4, %v2371_v45, %v2042_v39  ;;  %v2356_v39 = vsel %vm1161_vm2, %v2340_v17, %v4375_v37 }
 0x389   : > { %2181 = vrot.lane.b32.xlu1 %v1785_v60, %s3297_s16  ;;  %v2372_v43 = vsel %vm1182_vm3, %v2356_v39, %v4388_v58 }
 0x38a   : > { %2119 = vrot.lane.b32.xlu0 %v1816_v21, %s3296_s11 }
 0x38b   : > { %v2294_v5 = vpop.permute.xlu1 %2293 }
 0x38c   : > { %v2232_v0 = vpop.permute.xlu0 %2231  ;;  %v2449_v35 = vsel %vm1287_vm8, %v2433_v49, %v2294_v5 }
 0x38d   : > { %1993 = vrot.lane.b32.xlu1 %v1785_v60, %s3294_s9  ;;  %3165 = vmatprep.mubr.msk.f32.mxu1 %vm1313_vm9, %v2449_v35  ;;  %v2434_v3 = vsel %vm1266_vm7, %v2418_v61, %v2232_v0 }
 0x38e   : > { %1931 = vrot.lane.b32.xlu0 %v1816_v21, %s3292_s25 }
 0x38f   : > { %v2044_v51 = vpop.permute.xlu1 %2043 }
 0x390   : > { %v4407_v63 = vpop.permute.xlu0 %1853  ;;  %v2388_v49 = vsel %vm1203_vm4, %v2372_v43, %v2044_v51 }
 0x391   : > { %2245 = vrot.lane.b32.xlu1 %v1801_v31, %s3298_s22  ;;  %v2341_v28 = vsel %vm1140_vm1, %v4207_v29, %v4407_v63 }
 0x392   : > { %2183 = vrot.lane.b32.xlu0 %v1786_v10, %s3297_s16 }
 0x393   : > { %v2296_v19 = vpop.permute.xlu1 %2295 }
 0x394   : > { %v2106_v57 = vpop.permute.xlu0 %2105  ;;  %v2450_v1 = vsel %vm1287_vm8, %v2434_v3, %v2296_v19 }
 0x395   : > { %2057 = vrot.lane.b32.xlu1 %v1801_v31, %s3295_s10  ;;  %3166 = vmatmul.mubr.msk.f32.gmra.mrb[4].mxu1 %vm1313_vm9, %v2450_v1  ;;  %v2403_v40 = vsel %vm1224_vm5, %v2387_v25, %v2106_v57 }
 0x396   : > { %1995 = vrot.lane.b32.xlu0 %v1786_v10, %s3294_s9 }
 0x397   : > { %v4419_v56 = vpop.permute.xlu1 %1917 }
 0x398   : > { %v4421_v12 = vpop.permute.xlu0 %1855  ;;  %v2357_v61 = vsel %vm1161_vm2, %v2341_v28, %v4419_v56 }
 0x399   : > { %2309 = vrot.lane.b32.xlu1 %v1817_v4, %s3299_s14  ;;  %v2342_v29 = vsel %vm1140_vm1, %v4215_v47, %v4421_v12 }
 0x39a   : > { %2247 = vrot.lane.b32.xlu0 %v1802_v15, %s3298_s22 }
 0x39b   : > { %v2170_v18 = vpop.permute.xlu1 %2169 }
 0x39c   : > { %v2108_v24 = vpop.permute.xlu0 %2107  ;;  %v2419_v44 = vsel %vm1245_vm6, %v2403_v40, %v2170_v18 }
 0x39d   : > { %2121 = vrot.lane.b32.xlu1 %v1817_v4, %s3296_s11  ;;  %v2404_v5 = vsel %vm1224_vm5, %v2388_v49, %v2108_v24 }
 0x39e   : > { %2059 = vrot.lane.b32.xlu0 %v1802_v15, %s3295_s10 }
 0x39f   : > { %v1982_v36 = vpop.permute.xlu1 %1981 }
 0x3a0   : > { %v4427_v14 = vpop.permute.xlu0 %1919  ;;  %v2373_v3 = vsel %vm1182_vm3, %v2357_v61, %v1982_v36 }
 0x3a1   : > { %2123 = vrot.lane.b32.xlu1 %v1771_v48, %s3296_s11  ;;  %v2358_v63 = vsel %vm1161_vm2, %v2342_v29, %v4427_v14 }
 0x3a2   : > { %2311 = vrot.lane.b32.xlu0 %v1771_v48, %s3299_s14 }
 0x3a3   : > { %v2234_v32 = vpop.permute.xlu1 %2233 }
 0x3a4   : > { %v2172_v9 = vpop.permute.xlu0 %2171  ;;  %v2435_v16 = vsel %vm1266_vm7, %v2419_v44, %v2234_v32 }
 0x3a5   : > { %2187 = vrot.lane.b32.xlu1 %v1788_v27, %s3297_s16  ;;  %v2420_v50 = vsel %vm1245_vm6, %v2404_v5, %v2172_v9 }
 0x3a6   : > { %2185 = vrot.lane.b32.xlu0 %v1787_v11, %s3297_s16 }
 0x3a7   : > { %v2046_v46 = vpop.permute.xlu1 %2045 }
 0x3a8   : > { %v1984_v21 = vpop.permute.xlu0 %1983  ;;  %v2389_v1 = vsel %vm1203_vm4, %v2373_v3, %v2046_v46 }
 0x3a9   : > { %2251 = vrot.lane.b32.xlu1 %v1804_v34, %s3298_s22  ;;  %v2374_v56 = vsel %vm1182_vm3, %v2358_v63, %v1984_v21 }
 0x3aa   : > { %2249 = vrot.lane.b32.xlu0 %v1803_v38, %s3298_s22 }
 0x3ab   : > { %v2298_v55 = vpop.permute.xlu1 %2297 }
 0x3ac   : > { %v2236_v60 = vpop.permute.xlu0 %2235  ;;  %v2451_v13 = vsel %vm1287_vm8, %v2435_v16, %v2298_v55 }
 0x3ad   : > { %2315 = vrot.lane.b32.xlu1 %v1820_v62, %s3299_s14  ;;  %3168 = vmatprep.mubr.msk.f32.mxu1 %vm1313_vm9, %v2451_v13  ;;  %v2436_v22 = vsel %vm1266_vm7, %v2420_v50, %v2236_v60 }
 0x3ae   : > { %2313 = vrot.lane.b32.xlu0 %v1819_v54, %s3299_s14 }
 0x3af   : > { %v2048_v42 = vpop.permute.xlu1 %2047 }
 0x3b0   : > { %v1858_v33 = vpop.permute.xlu0 %1857  ;;  %v2390_v32 = vsel %vm1203_vm4, %v2374_v56, %v2048_v42 }
 0x3b1   : > { %v2343_v62 = vsel %vm1140_vm1, %v4231_v53, %v1858_v33 }
 0x3b3   : > { %v2300_v0 = vpop.permute.xlu1 %2299 }
 0x3b4   : > { %v2110_v35 = vpop.permute.xlu0 %2109  ;;  %v2452_v2 = vsel %vm1287_vm8, %v2436_v22, %v2300_v0 }
 0x3b5   : > { %3169 = vmatmul.mubr.msk.f32.gmra.mrb[6].mxu1 %vm1313_vm9, %v2452_v2  ;;  %v2405_v4 = vsel %vm1224_vm5, %v2389_v1, %v2110_v35 }
 0x3b7   : > { %v1922_v37 = vpop.permute.xlu1 %1921 }
 0x3b8   : > { %v1860_v7 = vpop.permute.xlu0 %1859  ;;  %v2359_v54 = vsel %vm1161_vm2, %v2343_v62, %v1922_v37 }
 0x3b9   : > { %v2344_v53 = vsel %vm1140_vm1, %v4239_v6, %v1860_v7 }
 0x3bb   : > { %v2174_v31 = vpop.permute.xlu1 %2173 }
 0x3bc   : > { %v2112_v58 = vpop.permute.xlu0 %2111  ;;  %v2421_v15 = vsel %vm1245_vm6, %v2405_v4, %v2174_v31 }
 0x3bd   : > { %v2406_v9 = vsel %vm1224_vm5, %v2390_v32, %v2112_v58 }
 0x3bf   : > { %v1986_v10 = vpop.permute.xlu1 %1985 }
 0x3c0   : > { %v1924_v23 = vpop.permute.xlu0 %1923  ;;  %v2375_v16 = vsel %vm1182_vm3, %v2359_v54, %v1986_v10 }
 0x3c1   : > { %v2360_v33 = vsel %vm1161_vm2, %v2344_v53, %v1924_v23 }
 0x3c3   : > { %v2238_v8 = vpop.permute.xlu1 %2237 }
 0x3c4   : > { %v2176_v51 = vpop.permute.xlu0 %2175  ;;  %v2437_v18 = vsel %vm1266_vm7, %v2421_v15, %v2238_v8 }
 0x3c5   : > { %v2422_v20 = vsel %vm1245_vm6, %v2406_v9, %v2176_v51 }
 0x3c7   : > { %v2050_v19 = vpop.permute.xlu1 %2049 }
 0x3c8   : > { %v1988_v57 = vpop.permute.xlu0 %1987  ;;  %v2391_v13 = vsel %vm1203_vm4, %v2375_v16, %v2050_v19 }
 0x3c9   : > { %v2376_v50 = vsel %vm1182_vm3, %v2360_v33, %v1988_v57 }
 0x3cb   : > { %v2302_v24 = vpop.permute.xlu1 %2301 }
 0x3cc   : > { %v2240_v48 = vpop.permute.xlu0 %2239  ;;  %v2453_v27 = vsel %vm1287_vm8, %v2437_v18, %v2302_v24 }
 0x3cd   : > { %3171 = vmatprep.mubr.msk.f32.mxu1 %vm1313_vm9, %v2453_v27  ;;  %v2438_v30 = vsel %vm1266_vm7, %v2422_v20, %v2240_v48 }
 0x3cf   : > { %v2052_v36 = vpop.permute.xlu1 %2051 }
 0x3d0   : > { %v1862_v11 = vpop.permute.xlu0 %1861  ;;  %v2392_v35 = vsel %vm1203_vm4, %v2376_v50, %v2052_v36  ;;  %v4550_v50 = vld [vmem:[%s4657_s5] ss:$0 sm:$0xff] }
 0x3d1   : > { %v2345_v57 = vsel %vm1140_vm1, %v4267_v26, %v1862_v11 }
 0x3d3   : > { %v2304_v34 = vpop.permute.xlu1 %2303 }
 0x3d4   : > { %v2114_v38 = vpop.permute.xlu0 %2113  ;;  %v2454_v47 = vsel %vm1287_vm8, %v2438_v30, %v2304_v34 }
 0x3d5   : > { %3172 = vmatmul.mubr.msk.f32.gmra.mrb[8].mxu1 %vm1313_vm9, %v2454_v47  ;;  %v2407_v17 = vsel %vm1224_vm5, %v2391_v13, %v2114_v38 }
 0x3d7   : > { %v1926_v12 = vpop.permute.xlu1 %1925 }
 0x3d8   : > { %v1864_v14 = vpop.permute.xlu0 %1863  ;;  %v2361_v1 = vsel %vm1161_vm2, %v2345_v57, %v1926_v12 }
 0x3d9   : > { %v2346_v26 = vsel %vm1140_vm1, %v4286_v41, %v1864_v14 }
 0x3db   : > { %v2178_v45 = vpop.permute.xlu1 %2177 }
 0x3dc   : > { %v2116_v46 = vpop.permute.xlu0 %2115  ;;  %v2423_v39 = vsel %vm1245_vm6, %v2407_v17, %v2178_v45 }
 0x3dd   : > { %v2408_v2 = vsel %vm1224_vm5, %v2392_v35, %v2116_v46 }
 0x3df   : > { %v1990_v21 = vpop.permute.xlu1 %1989 }
 0x3e0   : > { %v1928_v25 = vpop.permute.xlu0 %1927  ;;  %v2377_v4 = vsel %vm1182_vm3, %v2361_v1, %v1990_v21 }
 0x3e1   : > { %v2362_v11 = vsel %vm1161_vm2, %v2346_v26, %v1928_v25 }
 0x3e3   : > { %v2242_v40 = vpop.permute.xlu1 %2241 }
 0x3e4   : > { %v2180_v44 = vpop.permute.xlu0 %2179  ;;  %v2439_v43 = vsel %vm1266_vm7, %v2423_v39, %v2242_v40 }
 0x3e5   : > { %v2424_v37 = vsel %vm1245_vm6, %v2408_v2, %v2180_v44 }
 0x3e7   : > { %v2054_v55 = vpop.permute.xlu1 %2053 }
 0x3e8   : > { %v1992_v60 = vpop.permute.xlu0 %1991  ;;  %v2393_v24 = vsel %vm1203_vm4, %v2377_v4, %v2054_v55  ;;  %v3047_v4 = vld [vmem:[%s3381_s18 + $0x49] sm:$0xff] }
 0x3e9   : > { %v2378_v32 = vsel %vm1182_vm3, %v2362_v11, %v1992_v60 }
 0x3eb   : > { %v2306_v42 = vpop.permute.xlu1 %2305 }
 0x3ec   : > { %v2244_v49 = vpop.permute.xlu0 %2243  ;;  %v2455_v5 = vsel %vm1287_vm8, %v2439_v43, %v2306_v42 }
 0x3ed   : > { %3174 = vmatprep.mubr.msk.f32.mxu1 %vm1313_vm9, %v2455_v5  ;;  %v2440_v31 = vsel %vm1266_vm7, %v2424_v37, %v2244_v49  ;;  %v3046_v37 = vld [vmem:[%s3381_s18 + $0x39] sm:$0xff] }
 0x3ef   : > { %v2056_v22 = vpop.permute.xlu1 %2055 }
 0x3f0   : > { %v1866_v0 = vpop.permute.xlu0 %1865  ;;  %v2394_v30 = vsel %vm1203_vm4, %v2378_v32, %v2056_v22  ;;  %v3049_v32 = vld [vmem:[%s3381_s18 + $0x61] sm:$0xff] }
 0x3f1   : > { %v2347_v21 = vsel %vm1140_vm1, %v4324_v59, %v1866_v0  ;;  %v4555_v0 = vld [vmem:[%s4658_s6] ss:$0 sm:$0xff] }
 0x3f3   : > { %v2308_v58 = vpop.permute.xlu1 %2307 }
 0x3f4   : > { %v2118_v10 = vpop.permute.xlu0 %2117  ;;  %v2456_v6 = vsel %vm1287_vm8, %v2440_v31, %v2308_v58 }
 0x3f5   : > { %3175 = vmatmul.mubr.msk.f32.gmra.mrb[10].mxu1 %vm1313_vm9, %v2456_v6  ;;  %v2409_v48 = vsel %vm1224_vm5, %v2393_v24, %v2118_v10  ;;  %v3045_v10 = vld [vmem:[%s3381_s18 + $0x31] sm:$0xff] }
 0x3f7   : > { %v1930_v7 = vpop.permute.xlu1 %1929 }
 0x3f8   : > { %v1868_v23 = vpop.permute.xlu0 %1867  ;;  %v2363_v40 = vsel %vm1161_vm2, %v2347_v21, %v1930_v7  ;;  %v3051_v21 = vld [vmem:[%s3381_s18 + $0x79] sm:$0xff] }
 0x3f9   : > { %v2348_v25 = vsel %vm1140_vm1, %v4347_v52, %v1868_v23 }
 0x3fb   : > { %v2182_v8 = vpop.permute.xlu1 %2181 }
 0x3fc   : > { %v2120_v51 = vpop.permute.xlu0 %2119  ;;  %v2425_v27 = vsel %vm1245_vm6, %v2409_v48, %v2182_v8 }
 0x3fd   : > { %v2410_v34 = vsel %vm1224_vm5, %v2394_v30, %v2120_v51 }
 0x3ff   : > { %v1994_v28 = vpop.permute.xlu1 %1993 }
 0x400   : > { %v1932_v61 = vpop.permute.xlu0 %1931  ;;  %v2379_v62 = vsel %vm1182_vm3, %v2363_v40, %v1994_v28 }
 0x401   : > { %v2364_v44 = vsel %vm1161_vm2, %v2348_v25, %v1932_v61 }
 0x403   : > { %v2246_v3 = vpop.permute.xlu1 %2245 }
 0x404   : > { %v2184_v19 = vpop.permute.xlu0 %2183  ;;  %v2441_v29 = vsel %vm1266_vm7, %v2425_v27, %v2246_v3 }
 0x405   : > { %v2426_v38 = vsel %vm1245_vm6, %v2410_v34, %v2184_v19  ;;  %v3048_v19 = vld [vmem:[%s3381_s18 + $0x51] sm:$0xff] }
 0x407   : > { %v2058_v15 = vpop.permute.xlu1 %2057 }
 0x408   : > { %v1996_v18 = vpop.permute.xlu0 %1995  ;;  %v2395_v60 = vsel %vm1203_vm4, %v2379_v62, %v2058_v15 }
 0x409   : > { %v2380_v54 = vsel %vm1182_vm3, %v2364_v44, %v1996_v18 }
 0x40b   : > { %v2310_v63 = vpop.permute.xlu1 %2309 }
 0x40c   : > { %v2248_v56 = vpop.permute.xlu0 %2247  ;;  %v2457_v36 = vsel %vm1287_vm8, %v2441_v29, %v2310_v63 }
 0x40d   : > { %3177 = vmatprep.mubr.msk.f32.mxu1 %vm1313_vm9, %v2457_v36  ;;  %v2442_v47 = vsel %vm1266_vm7, %v2426_v38, %v2248_v56  ;;  %v3050_v36 = vld [vmem:[%s3381_s18 + $0x69] sm:$0xff] }
 0x40f   : > { %v2122_v9 = vpop.permute.xlu1 %2121 }
 0x410   : > { %v2060_v20 = vpop.permute.xlu0 %2059  ;;  %v2411_v17 = vsel %vm1224_vm5, %v2395_v60, %v2122_v9 }
 0x411   : > { %v2396_v13 = vsel %vm1203_vm4, %v2380_v54, %v2060_v20 }
 0x413   : > { %v2124_v12 = vpop.permute.xlu1 %2123 }
 0x414   : > { %v2312_v45 = vpop.permute.xlu0 %2311  ;;  %v2412_v59 = vsel %vm1224_vm5, %v2396_v13, %v2124_v12  ;;  %v3054_v13 = vld [vmem:[%s3381_s18 + $0x99] sm:$0xff] }
 0x415   : > { %v2458_v41 = vsel %vm1287_vm8, %v2442_v47, %v2312_v45 }
 0x416   : > { %3178 = vmatmul.mubr.msk.f32.gmra.mrb[12].mxu1 %vm1313_vm9, %v2458_v41  ;;  %v3052_v41 = vld [vmem:[%s3381_s18 + $0x81] sm:$0xff] }
 0x417   : > { %v2188_v14 = vpop.permute.xlu1 %2187 }
 0x418   : > { %v2186_v46 = vpop.permute.xlu0 %2185  ;;  %v2428_v52 = vsel %vm1245_vm6, %v2412_v59, %v2188_v14 }
 0x419   : > { %v2427_v39 = vsel %vm1245_vm6, %v2411_v17, %v2186_v46 }
 0x41b   : > { %v2252_v16 = vpop.permute.xlu1 %2251 }
 0x41c   : > { %v2250_v55 = vpop.permute.xlu0 %2249  ;;  %v2444_v43 = vsel %vm1266_vm7, %v2428_v52, %v2252_v16  ;;  %v3053_v52 = vld [vmem:[%s3381_s18 + $0x91] sm:$0xff] }
 0x41d   : > { %v2443_v42 = vsel %vm1266_vm7, %v2427_v39, %v2250_v55 }
 0x41f   : > { %v2316_v49 = vpop.permute.xlu1 %2315 }
 0x420   : > { %v2314_v5 = vpop.permute.xlu0 %2313  ;;  %v2460_v53 = vsel %vm1287_vm8, %v2444_v43, %v2316_v49 }
 0x421   : > { %v2459_v33 = vsel %vm1287_vm8, %v2443_v42, %v2314_v5 }
 0x422   : > { %3180 = vmatprep.mubr.msk.f32.mxu1 %vm1313_vm9, %v2459_v33 }
 0x423   : > { %3181 = vmatmul.mubr.msk.f32.gmra.mrb[14].mxu1 %vm1313_vm9, %v2460_v53 }
 0x428   : > { %v3161_v22 = vpop.f32.mrb[0].mxu1 }
 0x429   : > { %v2670_v35 = vmul.f32 %v3161_v22, %v4550_v50  ;;  %v2583_v2 = vpop.f32.mrb[1].mxu1 }
 0x42a   : > { %v2669_v31 = vmul.f32 %v4550_v50, %v2583_v2 }
 0x42b   : > { %v2693_v58 = vadd.f32 %v4555_v0, %v2670_v35  ;;  %v3056_v35 = vld [vmem:[%s3381_s18 + $0xb1] sm:$0xff] }
 0x42c   : > { %v2692_v6 = vadd.f32 %v4555_v0, %v2669_v31  ;;  %v3055_v31 = vld [vmem:[%s3381_s18 + $0xa9] sm:$0xff] }
 0x42d   : > { %v2725_v7 = vadd.f32 %v3046_v37, %v2693_v58 }
 0x42e   : > { %v2724_v23 = vadd.f32 %v3045_v10, %v2692_v6 }
 0x42f   : > { %v2741_v8 = vmax.f32 %v2725_v7, 0.0 }
 0x430   : > { %v2740_v51 = vmax.f32 %v2724_v23, 0.0 }
 0x431   : > { %2757 = vst.msk [vmem:[%s3388_s23 + $0x8] sm:$0xff] %vm1140_vm1, %v2741_v8 }
 0x432   : > { %2756 = vst.msk [vmem:[%s3388_s23] sm:$0xff] %vm1140_vm1, %v2740_v51 }
 0x448   : > { %v3164_v28 = vpop.f32.mrb[2].mxu1 }
 0x449   : > { %v2672_v61 = vmul.f32 %v3164_v28, %v4550_v50  ;;  %v2593_v3 = vpop.f32.mrb[3].mxu1 }
 0x44a   : > { %v2671_v57 = vmul.f32 %v4550_v50, %v2593_v3 }
 0x44b   : > { %v2695_v1 = vadd.f32 %v4555_v0, %v2672_v61  ;;  %v3058_v61 = vld [vmem:[%s3381_s18 + $0xc9] sm:$0xff] }
 0x44c   : > { %v2694_v15 = vadd.f32 %v4555_v0, %v2671_v57  ;;  %v3057_v57 = vld [vmem:[%s3381_s18 + $0xc1] sm:$0xff] }
 0x44d   : > { %v2727_v18 = vadd.f32 %v3048_v19, %v2695_v1 }
 0x44e   : > { %v2726_v24 = vadd.f32 %v3047_v4, %v2694_v15 }
 0x44f   : > { %v2743_v48 = vmax.f32 %v2727_v18, 0.0 }
 0x450   : > { %v2742_v27 = vmax.f32 %v2726_v24, 0.0 }
 0x451   : > { %2759 = vst.msk [vmem:[%s3388_s23 + $0x18] sm:$0xff] %vm1140_vm1, %v2743_v48 }
 0x452   : > { %2758 = vst.msk [vmem:[%s3388_s23 + $0x10] sm:$0xff] %vm1140_vm1, %v2742_v27 }
 0x468   : > { %v3167_v29 = vpop.f32.mrb[4].mxu1 }
 0x469   : > { %v2674_v63 = vmul.f32 %v3167_v29, %v4550_v50  ;;  %v2603_v56 = vpop.f32.mrb[5].mxu1 }
 0x46a   : > { %v2673_v26 = vmul.f32 %v4550_v50, %v2603_v56 }
 0x46b   : > { %v2697_v11 = vadd.f32 %v4555_v0, %v2674_v63  ;;  %v3060_v63 = vld [vmem:[%s3381_s18 + $0xe1] sm:$0xff] }
 0x46c   : > { %v2696_v9 = vadd.f32 %v4555_v0, %v2673_v26  ;;  %v3059_v26 = vld [vmem:[%s3381_s18 + $0xd9] sm:$0xff] }
 0x46d   : > { %v2729_v20 = vadd.f32 %v3050_v36, %v2697_v11 }
 0x46e   : > { %v2728_v30 = vadd.f32 %v3049_v32, %v2696_v9 }
 0x46f   : > { %v2745_v34 = vmax.f32 %v2729_v20, 0.0 }
 0x470   : > { %v2744_v38 = vmax.f32 %v2728_v30, 0.0 }
 0x471   : > { %2761 = vst.msk [vmem:[%s3388_s23 + $0x28] sm:$0xff] %vm1140_vm1, %v2745_v34 }
 0x472   : > { %2760 = vst.msk [vmem:[%s3388_s23 + $0x20] sm:$0xff] %vm1140_vm1, %v2744_v38 }
 0x488   : > { %v3170_v47 = vpop.f32.mrb[6].mxu1 }
 0x489   : > { %v2676_v12 = vmul.f32 %v3170_v47, %v4550_v50  ;;  %v2613_v45 = vpop.f32.mrb[7].mxu1 }
 0x48a   : > { %v2675_v14 = vmul.f32 %v4550_v50, %v2613_v45 }
 0x48b   : > { %v2699_v46 = vadd.f32 %v4555_v0, %v2676_v12 }
 0x48c   : > { %v2698_v25 = vadd.f32 %v4555_v0, %v2675_v14 }
 0x48d   : > { %v2731_v40 = vadd.f32 %v3052_v41, %v2699_v46 }
 0x48e   : > { %v2730_v44 = vadd.f32 %v3051_v21, %v2698_v25 }
 0x48f   : > { %v2747_v62 = vmax.f32 %v2731_v40, 0.0 }
 0x490   : > { %v2746_v54 = vmax.f32 %v2730_v44, 0.0 }
 0x491   : > { %2763 = vst.msk [vmem:[%s3388_s23 + $0x38] sm:$0xff] %vm1140_vm1, %v2747_v62 }
 0x492   : > { %2762 = vst.msk [vmem:[%s3388_s23 + $0x30] sm:$0xff] %vm1140_vm1, %v2746_v54 }
 0x4a8   : > { %v3173_v16 = vpop.f32.mrb[8].mxu1 }
 0x4a9   : > { %v2678_v55 = vmul.f32 %v3173_v16, %v4550_v50  ;;  %v2623_v60 = vpop.f32.mrb[9].mxu1 }
 0x4aa   : > { %v2677_v17 = vmul.f32 %v4550_v50, %v2623_v60 }
 0x4ab   : > { %v2701_v59 = vadd.f32 %v4555_v0, %v2678_v55 }
 0x4ac   : > { %v2700_v39 = vadd.f32 %v4555_v0, %v2677_v17 }
 0x4ad   : > { %v2733_v43 = vadd.f32 %v3054_v13, %v2701_v59 }
 0x4ae   : > { %v2732_v42 = vadd.f32 %v3053_v52, %v2700_v39 }
 0x4af   : > { %v2749_v49 = vmax.f32 %v2733_v43, 0.0 }
 0x4b0   : > { %v2748_v5 = vmax.f32 %v2732_v42, 0.0 }
 0x4b1   : > { %2765 = vst.msk [vmem:[%s3388_s23 + $0x48] sm:$0xff] %vm1140_vm1, %v2749_v49 }
 0x4b2   : > { %2764 = vst.msk [vmem:[%s3388_s23 + $0x40] sm:$0xff] %vm1140_vm1, %v2748_v5 }
 0x4c8   : > { %v3176_v53 = vpop.f32.mrb[10].mxu1 }
 0x4c9   : > { %v2680_v33 = vmul.f32 %v3176_v53, %v4550_v50  ;;  %v2633_v22 = vpop.f32.mrb[11].mxu1 }
 0x4ca   : > { %v2679_v2 = vmul.f32 %v4550_v50, %v2633_v22 }
 0x4cb   : > { %v2703_v37 = vadd.f32 %v4555_v0, %v2680_v33 }
 0x4cc   : > { %v2702_v58 = vadd.f32 %v4555_v0, %v2679_v2 }
 0x4cd   : > { %v2735_v10 = vadd.f32 %v3056_v35, %v2703_v37 }
 0x4ce   : > { %v2734_v6 = vadd.f32 %v3055_v31, %v2702_v58 }
 0x4cf   : > { %v2751_v7 = vmax.f32 %v2735_v10, 0.0 }
 0x4d0   : > { %v2750_v23 = vmax.f32 %v2734_v6, 0.0 }
 0x4d1   : > { %2767 = vst.msk [vmem:[%s3388_s23 + $0x58] sm:$0xff] %vm1140_vm1, %v2751_v7 }
 0x4d2   : > { %2766 = vst.msk [vmem:[%s3388_s23 + $0x50] sm:$0xff] %vm1140_vm1, %v2750_v23 }
 0x4e9   : > { %v3179_v8 = vpop.f32.mrb[12].mxu1 }
 0x4ea   : > { %v2682_v51 = vmul.f32 %v3179_v8, %v4550_v50  ;;  %v2643_v28 = vpop.f32.mrb[13].mxu1 }
 0x4eb   : > { %v2681_v3 = vmul.f32 %v4550_v50, %v2643_v28 }
 0x4ec   : > { %v2705_v19 = vadd.f32 %v4555_v0, %v2682_v51 }
 0x4ed   : > { %v2704_v1 = vadd.f32 %v4555_v0, %v2681_v3 }
 0x4ee   : > { %v2737_v4 = vadd.f32 %v3058_v61, %v2705_v19 }
 0x4ef   : > { %v2736_v15 = vadd.f32 %v3057_v57, %v2704_v1 }
 0x4f0   : > { %v2753_v18 = vmax.f32 %v2737_v4, 0.0 }
 0x4f1   : > { %v2752_v24 = vmax.f32 %v2736_v15, 0.0 }
 0x4f2   : > { %2769 = vst.msk [vmem:[%s3388_s23 + $0x68] sm:$0xff] %vm1140_vm1, %v2753_v18 }
 0x4f3   : > { %2768 = vst.msk [vmem:[%s3388_s23 + $0x60] sm:$0xff] %vm1140_vm1, %v2752_v24 }
 0x4f6   : > { %v3182_v48 = vpop.f32.mrb[14].mxu1 }
 0x4f7   : > { %v2684_v27 = vmul.f32 %v3182_v48, %v4550_v50  ;;  %v2653_v29 = vpop.f32.mrb[15].mxu1 }
 0x4f8   : > { %v2683_v56 = vmul.f32 %v4550_v50, %v2653_v29 }
 0x4f9   : > { %v2707_v36 = vadd.f32 %v4555_v0, %v2684_v27 }
 0x4fa   : > { %v2706_v11 = vadd.f32 %v4555_v0, %v2683_v56 }
 0x4fb   : > { %v2739_v32 = vadd.f32 %v3060_v63, %v2707_v36 }
 0x4fc   : > { %v2738_v9 = vadd.f32 %v3059_v26, %v2706_v11 }
 0x4fd   : > { %v2755_v20 = vmax.f32 %v2739_v32, 0.0 }
 0x4fe   : > { %v2754_v30 = vmax.f32 %v2738_v9, 0.0 }
 0x4ff   : > { %2771 = vst.msk [vmem:[%s3388_s23 + $0x78] sm:$0xff] %vm1140_vm1, %v2755_v20 }
 0x500   : > { %2770 = vst.msk [vmem:[%s3388_s23 + $0x70] sm:$0xff] %vm1140_vm1, %v2754_v30 }
 0x501 PF: > { %s17_s28 = sadd.s32 1, %s3290_s28   ;;  %s4660_s24 = smov %s3282_s26 }
 0x502   : > { %p14_p10 = scmp.ge.s32.totalorder %s17_s28, 6   ;;  %s4661_s25 = smov %s3286_s27 }
 0x503   : > { %s4662_s26 = smov %s4665_s29  ;;  %s4663_s27 = smov %s4669_s30 }
 0x504   :  { %16 = sbr.rel (!%p14_p10) target bundleno = 3 (0x3), region = 91 }

</bundles_post_ra>
